<compile_context>
chip_gen: v7x
topology: tpu7x:2x2x1
jax: 0.10.0
libtpu: 0.0.40
codegen_flags: <defaults>
</compile_context>

<pallas_src>
import jax
import jax.numpy as jnp
from jax import lax
from jax.experimental import pallas as pl
from jax.experimental.pallas import tpu as pltpu


def _round_up(x, m):
    return -(-x // m) * m


def make_cnn2_kernel(filter_sizes, *, S, TB, Vpad, CH, Opad, compute_dtype):
    """Fused embedding+conv+pool+heads kernel for one batch tile."""
    grp_off = []
    g = 0
    for fs in filter_sizes:
        grp_off.append(g)
        g += fs

    def kernel(ids_ref, wf_ref, bconv_ref, whead_ref, bhead_ref, out_ref):
        # In-kernel embedding "gather": one_hot(ids) @ (W_emb @ W_conv) — a
        # single wide MXU pass that also evaluates every conv filter / shift.
        ids = ids_ref[...]                                      # [TB*S, 1] i32
        iota = lax.broadcasted_iota(jnp.int32, (TB * S, Vpad), 1)
        onehot = (iota == ids).astype(compute_dtype)            # [TB*S, Vpad]
        y = jnp.dot(onehot, wf_ref[...], preferred_element_type=jnp.float32)
        y = y.reshape(TB, S, y.shape[-1])                       # [TB, S, Cpad]

        pooled = []
        for i, fs in enumerate(filter_sizes):
            L = S - fs + 1
            g0 = grp_off[i]
            # Each (filter, shift) group is 128 lanes -> whole-vreg slices.
            acc = y[:, 0:L, g0 * CH:(g0 + 1) * CH]
            for j in range(1, fs):
                gj = g0 + j
                acc = acc + y[:, j:j + L, gj * CH:(gj + 1) * CH]
            b_i = bconv_ref[:, i * CH:(i + 1) * CH]             # [1, CH] f32
            conv = jnp.maximum(acc + b_i[:, None, :], 0.0)      # ReLU
            pooled.append(jnp.max(conv, axis=1))                # max_pool over time

        cat = jnp.concatenate(pooled, axis=1)                   # [TB, NF*CH] f32
        # dropout1 / dropout2 are identity at inference time.

        # Fused FC heads: two Opad-lane groups (sigmoid head, relu head).
        heads = jnp.dot(cat.astype(compute_dtype), whead_ref[...],
                        preferred_element_type=jnp.float32) + bhead_ref[...]
        out1 = jax.nn.sigmoid(heads[:, :Opad])
        out2 = jnp.maximum(heads[:, Opad:], 0.0)
        out_ref[...] = (out1 * out2).astype(out_ref.dtype)      # lane-dense store

    return kernel


def prepare_cnn2_weights(params, *, filter_sizes, n_filters, output_dim,
                         compute_dtype=jnp.bfloat16):
    """Hoisted (call once) weight prep: fuse embedding into convs, pad to lanes."""
    nf = n_filters
    NF = len(filter_sizes)
    V, E = params['embedding'].shape
    CH = _round_up(max(nf, 1), 128)            # lanes per (filter, shift) group
    Opad = _round_up(max(output_dim, 1), 128)  # lanes per FC head
    Vpad = _round_up(max(V, 1), 128)
    Cpad = sum(filter_sizes) * CH

    emb_tab = params['embedding'].astype(jnp.float32)

    # W_fused[v, (g+j)*CH + f] = sum_e Emb[v, e] * conv_w[f, 0, j, e]
    w_fused = jnp.zeros((Vpad, Cpad), jnp.float32)
    g = 0
    for i, fs in enumerate(filter_sizes):
        w = params[f'conv{i}_w'].astype(jnp.float32)            # [nf, 1, fs, E]
        for j in range(fs):
            blk = jnp.dot(emb_tab, w[:, 0, j, :].T,
                          preferred_element_type=jnp.float32,
                          precision=lax.Precision.HIGHEST)      # [V, nf]
            w_fused = w_fused.at[:V, (g + j) * CH:(g + j) * CH + nf].set(blk)
        g += fs
    w_fused = w_fused.astype(compute_dtype)

    b_conv = jnp.zeros((1, NF * CH), jnp.float32)
    for i in range(NF):
        b_conv = b_conv.at[0, i * CH:i * CH + nf].set(
            params[f'conv{i}_b'].astype(jnp.float32))

    # Fused heads laid out to match the padded feature layout (zero rows for
    # padded channels, zero columns beyond output_dim).
    w_heads = jnp.zeros((NF * CH, 2 * Opad), jnp.float32)
    for i in range(NF):
        rows = slice(i * CH, i * CH + nf)
        cols = slice(i * nf, (i + 1) * nf)
        w_heads = w_heads.at[rows, 0:output_dim].set(
            params['fc1_w'][:, cols].T.astype(jnp.float32))
        w_heads = w_heads.at[rows, Opad:Opad + output_dim].set(
            params['fc2_w'][:, cols].T.astype(jnp.float32))
    w_heads = w_heads.astype(compute_dtype)

    b_heads = jnp.zeros((1, 2 * Opad), jnp.float32)
    b_heads = b_heads.at[0, 0:output_dim].set(params['fc1_b'].astype(jnp.float32))
    b_heads = b_heads.at[0, Opad:Opad + output_dim].set(
        params['fc2_b'].astype(jnp.float32))

    return {'w_fused': w_fused, 'b_conv': b_conv,
            'w_heads': w_heads, 'b_heads': b_heads,
            'CH': CH, 'Opad': Opad, 'Vpad': Vpad}


def cnn2_forward(text, prep, *, filter_sizes, output_dim,
                 block_b=128, compute_dtype=jnp.bfloat16):
    B, S = text.shape
    Vpad, Cpad = prep['w_fused'].shape
    CH, Opad = prep['CH'], prep['Opad']

    # Batch tile: big enough to amortize per-step overhead and fill MXU rows
    # (TB*S), but never padding a tiny batch up to block_b.  Keeping multiple
    # grid steps lets the "parallel" axis shard across v7x's two TensorCores.
    TB = min(_round_up(max(block_b, 8), 8), _round_up(B, 8))
    B_pad = _round_up(B, TB)

    ids = text.astype(jnp.int32)
    if B_pad != B:
        ids = jnp.pad(ids, ((0, B_pad - B), (0, 0)))   # padded rows -> token 0
    ids_flat = ids.reshape(B_pad * S, 1)               # simple 2-D DMA tile

    kernel = make_cnn2_kernel(tuple(filter_sizes), S=S, TB=TB, Vpad=Vpad,
                              CH=CH, Opad=Opad, compute_dtype=compute_dtype)

    # Explicit per-step VMEM budget (v7x has 64 MiB physical per TensorCore).
    dsz = jnp.dtype(compute_dtype).itemsize
    weight_bytes = sum(int(prep[k].size) * prep[k].dtype.itemsize
                       for k in ('w_fused', 'b_conv', 'w_heads', 'b_heads'))
    est = (2 * TB * S * 4                       # ids tile (double-buffered)
           + 2 * TB * Opad * 4                  # output tile (double-buffered)
           + TB * S * (Vpad * dsz + Cpad * 4)   # one-hot + f32 conv matmul result
           + 4 * TB * S * CH * 4                # shifted-add / pool temporaries
           + 2 * weight_bytes)                  # resident weights
    vmem_limit = max(32 << 20, min(int(est * 1.5), 56 << 20))

    out = pl.pallas_call(
        kernel,
        out_shape=jax.ShapeDtypeStruct((B_pad, Opad), jnp.float32),
        grid=(B_pad // TB,),
        in_specs=[
            pl.BlockSpec((TB * S, 1), lambda i: (i, 0)),
            pl.BlockSpec(prep['w_fused'].shape, lambda i: (0, 0)),
            pl.BlockSpec(prep['b_conv'].shape, lambda i: (0, 0)),
            pl.BlockSpec(prep['w_heads'].shape, lambda i: (0, 0)),
            pl.BlockSpec(prep['b_heads'].shape, lambda i: (0, 0)),
        ],
        out_specs=pl.BlockSpec((TB, Opad), lambda i: (i, 0)),
        compiler_params=pltpu.CompilerParams(
            dimension_semantics=("parallel",),      # megacore on v7x
            vmem_limit_bytes=vmem_limit,
        ),
    )(ids_flat, prep['w_fused'], prep['b_conv'], prep['w_heads'], prep['b_heads'])

    return out[:B, :output_dim]


def ref_forward(text, params, *, filter_sizes, n_filters, output_dim):
    """Pure-JAX f32 reference matching the PyTorch forward (eval mode)."""
    emb = jnp.take(params['embedding'], text, axis=0)   # [B, S, E]
    B, S, E = emb.shape
    hp = lax.Precision.HIGHEST
    pooled = []
    for i, fs in enumerate(filter_sizes):
        w = params[f'conv{i}_w'].reshape(n_filters, fs * E)
        b = params[f'conv{i}_b']
        L = S - fs + 1
        rows = []
        for t in range(L):
            window = emb[:, t:t + fs, :].reshape(B, fs * E)
            rows.append(jnp.dot(window, w.T, precision=hp) + b)
        conv = jnp.maximum(jnp.stack(rows, axis=1), 0.0)    # [B, L, nf]
        pooled.append(jnp.max(conv, axis=1))
    cat = jnp.concatenate(pooled, axis=1)
    out1 = jax.nn.sigmoid(jnp.dot(cat, params['fc1_w'].T, precision=hp)
                          + params['fc1_b'])
    out2 = jnp.maximum(jnp.dot(cat, params['fc2_w'].T, precision=hp)
                       + params['fc2_b'], 0.0)
    return out1 * out2


def init_params(key, *, vocab_size, embedding_dim, n_filters, filter_sizes,
                output_dim, pad_idx):
    keys = jax.random.split(key, 3 + 2 * len(filter_sizes) + 4)
    ki = iter(keys)
    params = {}
    emb = jax.random.normal(next(ki), (vocab_size, embedding_dim), jnp.float32)
    emb = emb.at[pad_idx].set(0.0)                      # padding_idx row zeroed
    params['embedding'] = emb
    for i, fs in enumerate(filter_sizes):
        params[f'conv{i}_w'] = 0.1 * jax.random.normal(
            next(ki), (n_filters, 1, fs, embedding_dim), jnp.float32)
        params[f'conv{i}_b'] = 0.1 * jax.random.normal(
            next(ki), (n_filters,), jnp.float32)
    feat = len(filter_sizes) * n_filters
    params['fc1_w'] = 0.1 * jax.random.normal(next(ki), (output_dim, feat), jnp.float32)
    params['fc1_b'] = 0.1 * jax.random.normal(next(ki), (output_dim,), jnp.float32)
    params['fc2_w'] = 0.1 * jax.random.normal(next(ki), (output_dim, feat), jnp.float32)
    params['fc2_b'] = 0.1 * jax.random.normal(next(ki), (output_dim,), jnp.float32)
    return params


if __name__ == "__main__":
    vocab_size = 50
    embedding_dim = 32
    n_filters = 8
    filter_sizes = (2, 3, 4)
    output_dim = 4
    pad_idx = 0
    batch, seq = 2, 16

    key = jax.random.PRNGKey(0)
    pkey, tkey = jax.random.split(key)
    params = init_params(pkey, vocab_size=vocab_size, embedding_dim=embedding_dim,
                         n_filters=n_filters, filter_sizes=filter_sizes,
                         output_dim=output_dim, pad_idx=pad_idx)
    text = jax.random.randint(tkey, (batch, seq), 0, vocab_size, dtype=jnp.int32)

    ref = ref_forward(text, params, filter_sizes=filter_sizes,
                      n_filters=n_filters, output_dim=output_dim)

    # f32 compute path: must match the reference tightly.
    prep_f32 = prepare_cnn2_weights(params, filter_sizes=filter_sizes,
                                    n_filters=n_filters, output_dim=output_dim,
                                    compute_dtype=jnp.float32)
    out_f32 = cnn2_forward(text, prep_f32, filter_sizes=filter_sizes,
                           output_dim=output_dim, compute_dtype=jnp.float32)
    out_f32 = jax.block_until_ready(out_f32)
    assert out_f32.shape == (batch, output_dim)
    assert jnp.allclose(out_f32, ref, atol=1e-4, rtol=1e-4), (out_f32, ref)

    # bf16 matmul path (default, faster on MXU): loose tolerance vs f32 ref.
    prep_bf16 = prepare_cnn2_weights(params, filter_sizes=filter_sizes,
                                     n_filters=n_filters, output_dim=output_dim,
                                     compute_dtype=jnp.bfloat16)
    out_bf16 = cnn2_forward(text, prep_bf16, filter_sizes=filter_sizes,
                            output_dim=output_dim, compute_dtype=jnp.bfloat16)
    out_bf16 = jax.block_until_ready(out_bf16)
    assert out_bf16.shape == (batch, output_dim)
    assert jnp.allclose(out_bf16, ref, atol=3e-2, rtol=3e-2), (out_bf16, ref)

    print("KERNEL_OK")
</pallas_src>

<mosaic_0001>
module attributes {stable_mosaic.version = 11 : i64} {
  func.func @kernel(%arg0: i32, %arg1: memref<128x1xi32, #tpu.memory_space<vmem>>, %arg2: memref<128x1152xf32, #tpu.memory_space<vmem>>, %arg3: memref<1x384xf32, #tpu.memory_space<vmem>>, %arg4: memref<384x256xf32, #tpu.memory_space<vmem>>, %arg5: memref<1x256xf32, #tpu.memory_space<vmem>>, %arg6: memref<8x128xf32, #tpu.memory_space<vmem>>) attributes {dimension_semantics = [#tpu.dimension_semantics<parallel>], iteration_bounds = array<i64: 1>, scalar_prefetch = 0 : i64, scratch_operands = 0 : i64, tpu.core_type = #tpu.core_type<tc>, window_params = [{transform_indices = @transform_0, window_bounds = array<i64: 128, 1>}, {pipeline_mode = #tpu.pipeline_mode<synchronous>, transform_indices = @transform_1, window_bounds = array<i64: 128, 1152>}, {pipeline_mode = #tpu.pipeline_mode<synchronous>, transform_indices = @transform_2, window_bounds = array<i64: 1, 384>}, {pipeline_mode = #tpu.pipeline_mode<synchronous>, transform_indices = @transform_3, window_bounds = array<i64: 384, 256>}, {pipeline_mode = #tpu.pipeline_mode<synchronous>, transform_indices = @transform_4, window_bounds = array<i64: 1, 256>}, {transform_indices = @transform_5, window_bounds = array<i64: 8, 128>}]} {
    %c0 = arith.constant 0 : index
    %c0_0 = arith.constant 0 : index
    %0 = vector.load %arg1[%c0, %c0_0] : memref<128x1xi32, #tpu.memory_space<vmem>>, vector<128x1xi32>
    %1 = tpu.iota {dimensions = array<i32: 1>} : vector<128x128xi32>
    %2 = vector.broadcast %0 : vector<128x1xi32> to vector<128x128xi32>
    %3 = arith.cmpi eq, %1, %2 : vector<128x128xi32>
    %4 = arith.extui %3 : vector<128x128xi1> to vector<128x128xi32>
    %5 = arith.sitofp %4 : vector<128x128xi32> to vector<128x128xf32>
    %c0_1 = arith.constant 0 : index
    %c0_2 = arith.constant 0 : index
    %6 = vector.load %arg2[%c0_1, %c0_2] : memref<128x1152xf32, #tpu.memory_space<vmem>>, vector<128x1152xf32>
    %cst = arith.constant dense<0.000000e+00> : vector<128x1152xf32>
    %7 = tpu.matmul %5, %6, %cst {dimension_numbers = #tpu.dot_dimension_numbers<[1], [0], [0], [1], [0, 0, 1, 1], [], []>} : vector<128x128xf32>, vector<128x1152xf32>, vector<128x1152xf32> -> vector<128x1152xf32>
    %8 = vector.shape_cast %7 : vector<128x1152xf32> to vector<8x16x1152xf32>
    %9 = vector.extract_strided_slice %8 {offsets = [0, 0, 0], sizes = [8, 15, 128], strides = [1, 1, 1]} : vector<8x16x1152xf32> to vector<8x15x128xf32>
    %10 = vector.extract_strided_slice %8 {offsets = [0, 1, 128], sizes = [8, 15, 128], strides = [1, 1, 1]} : vector<8x16x1152xf32> to vector<8x15x128xf32>
    %11 = arith.addf %9, %10 : vector<8x15x128xf32>
    %c0_3 = arith.constant 0 : index
    %c0_4 = arith.constant 0 : index
    %12 = vector.load %arg3[%c0_3, %c0_4] : memref<1x384xf32, #tpu.memory_space<vmem>>, vector<1x128xf32>
    %13 = vector.shape_cast %12 : vector<1x128xf32> to vector<1x1x128xf32>
    %14 = vector.broadcast %13 : vector<1x1x128xf32> to vector<8x15x128xf32>
    %15 = arith.addf %11, %14 : vector<8x15x128xf32>
    %cst_5 = arith.constant 0.000000e+00 : f32
    %16 = vector.broadcast %cst_5 : f32 to vector<8x15x128xf32>
    %17 = arith.maximumf %15, %16 : vector<8x15x128xf32>
    %cst_6 = arith.constant dense<0xFF800000> : vector<8x128xf32>
    %18 = vector.multi_reduction <maximumf>, %17, %cst_6 [1] : vector<8x15x128xf32> to vector<8x128xf32>
    %19 = vector.extract_strided_slice %8 {offsets = [0, 0, 256], sizes = [8, 14, 128], strides = [1, 1, 1]} : vector<8x16x1152xf32> to vector<8x14x128xf32>
    %20 = vector.extract_strided_slice %8 {offsets = [0, 1, 384], sizes = [8, 14, 128], strides = [1, 1, 1]} : vector<8x16x1152xf32> to vector<8x14x128xf32>
    %21 = arith.addf %19, %20 : vector<8x14x128xf32>
    %22 = vector.extract_strided_slice %8 {offsets = [0, 2, 512], sizes = [8, 14, 128], strides = [1, 1, 1]} : vector<8x16x1152xf32> to vector<8x14x128xf32>
    %23 = arith.addf %21, %22 : vector<8x14x128xf32>
    %c0_7 = arith.constant 0 : index
    %c128 = arith.constant 128 : index
    %24 = vector.load %arg3[%c0_7, %c128] : memref<1x384xf32, #tpu.memory_space<vmem>>, vector<1x128xf32>
    %25 = vector.shape_cast %24 : vector<1x128xf32> to vector<1x1x128xf32>
    %26 = vector.broadcast %25 : vector<1x1x128xf32> to vector<8x14x128xf32>
    %27 = arith.addf %23, %26 : vector<8x14x128xf32>
    %cst_8 = arith.constant 0.000000e+00 : f32
    %28 = vector.broadcast %cst_8 : f32 to vector<8x14x128xf32>
    %29 = arith.maximumf %27, %28 : vector<8x14x128xf32>
    %cst_9 = arith.constant dense<0xFF800000> : vector<8x128xf32>
    %30 = vector.multi_reduction <maximumf>, %29, %cst_9 [1] : vector<8x14x128xf32> to vector<8x128xf32>
    %31 = vector.extract_strided_slice %8 {offsets = [0, 0, 640], sizes = [8, 13, 128], strides = [1, 1, 1]} : vector<8x16x1152xf32> to vector<8x13x128xf32>
    %32 = vector.extract_strided_slice %8 {offsets = [0, 1, 768], sizes = [8, 13, 128], strides = [1, 1, 1]} : vector<8x16x1152xf32> to vector<8x13x128xf32>
    %33 = arith.addf %31, %32 : vector<8x13x128xf32>
    %34 = vector.extract_strided_slice %8 {offsets = [0, 2, 896], sizes = [8, 13, 128], strides = [1, 1, 1]} : vector<8x16x1152xf32> to vector<8x13x128xf32>
    %35 = arith.addf %33, %34 : vector<8x13x128xf32>
    %36 = vector.extract_strided_slice %8 {offsets = [0, 3, 1024], sizes = [8, 13, 128], strides = [1, 1, 1]} : vector<8x16x1152xf32> to vector<8x13x128xf32>
    %37 = arith.addf %35, %36 : vector<8x13x128xf32>
    %c0_10 = arith.constant 0 : index
    %c256 = arith.constant 256 : index
    %38 = vector.load %arg3[%c0_10, %c256] : memref<1x384xf32, #tpu.memory_space<vmem>>, vector<1x128xf32>
    %39 = vector.shape_cast %38 : vector<1x128xf32> to vector<1x1x128xf32>
    %40 = vector.broadcast %39 : vector<1x1x128xf32> to vector<8x13x128xf32>
    %41 = arith.addf %37, %40 : vector<8x13x128xf32>
    %cst_11 = arith.constant 0.000000e+00 : f32
    %42 = vector.broadcast %cst_11 : f32 to vector<8x13x128xf32>
    %43 = arith.maximumf %41, %42 : vector<8x13x128xf32>
    %cst_12 = arith.constant dense<0xFF800000> : vector<8x128xf32>
    %44 = vector.multi_reduction <maximumf>, %43, %cst_12 [1] : vector<8x13x128xf32> to vector<8x128xf32>
    %45 = tpu.concatenate %18, %30, %44 in 1 : vector<8x128xf32>, vector<8x128xf32>, vector<8x128xf32> -> vector<8x384xf32>
    %c0_13 = arith.constant 0 : index
    %c0_14 = arith.constant 0 : index
    %46 = vector.load %arg4[%c0_13, %c0_14] : memref<384x256xf32, #tpu.memory_space<vmem>>, vector<384x256xf32>
    %cst_15 = arith.constant dense<0.000000e+00> : vector<8x256xf32>
    %47 = tpu.matmul %45, %46, %cst_15 {dimension_numbers = #tpu.dot_dimension_numbers<[1], [0], [0], [1], [0, 0, 1, 1], [], []>} : vector<8x384xf32>, vector<384x256xf32>, vector<8x256xf32> -> vector<8x256xf32>
    %c0_16 = arith.constant 0 : index
    %c0_17 = arith.constant 0 : index
    %48 = vector.load %arg5[%c0_16, %c0_17] : memref<1x256xf32, #tpu.memory_space<vmem>>, vector<1x256xf32>
    %49 = vector.broadcast %48 : vector<1x256xf32> to vector<8x256xf32>
    %50 = arith.addf %47, %49 : vector<8x256xf32>
    %51 = vector.extract_strided_slice %50 {offsets = [0, 0], sizes = [8, 128], strides = [1, 1]} : vector<8x256xf32> to vector<8x128xf32>
    %52 = arith.negf %51 : vector<8x128xf32>
    %53 = math.exp %52 : vector<8x128xf32>
    %cst_18 = arith.constant 1.000000e+00 : f32
    %54 = vector.broadcast %cst_18 : f32 to vector<8x128xf32>
    %55 = arith.addf %54, %53 : vector<8x128xf32>
    %56 = arith.divf %54, %55 : vector<8x128xf32>
    %57 = vector.extract_strided_slice %50 {offsets = [0, 128], sizes = [8, 128], strides = [1, 1]} : vector<8x256xf32> to vector<8x128xf32>
    %cst_19 = arith.constant 0.000000e+00 : f32
    %58 = vector.broadcast %cst_19 : f32 to vector<8x128xf32>
    %59 = arith.maximumf %57, %58 : vector<8x128xf32>
    %60 = arith.mulf %56, %59 : vector<8x128xf32>
    %c0_20 = arith.constant 0 : index
    %c0_21 = arith.constant 0 : index
    %61 = vector.load %arg6[%c0_20, %c0_21] : memref<8x128xf32, #tpu.memory_space<vmem>>, vector<8x128xf32>
    tpu.vector_store %arg6[%c0_20, %c0_21], %60 {strides = array<i32>} : memref<8x128xf32, #tpu.memory_space<vmem>>, vector<8x128xf32>,
    return
  }
  func.func @transform_0(%arg0: i32) -> (i32, i32) {
    %c0_i32 = arith.constant 0 : i32
    %c0_i32_0 = arith.constant 0 : i32
    return %arg0, %c0_i32 : i32, i32
  }
  func.func @transform_1(%arg0: i32) -> (i32, i32) {
    %c0_i32 = arith.constant 0 : i32
    %c0_i32_0 = arith.constant 0 : i32
    %c0_i32_1 = arith.constant 0 : i32
    return %c0_i32, %c0_i32_0 : i32, i32
  }
  func.func @transform_2(%arg0: i32) -> (i32, i32) {
    %c0_i32 = arith.constant 0 : i32
    %c0_i32_0 = arith.constant 0 : i32
    %c0_i32_1 = arith.constant 0 : i32
    return %c0_i32, %c0_i32_0 : i32, i32
  }
  func.func @transform_3(%arg0: i32) -> (i32, i32) {
    %c0_i32 = arith.constant 0 : i32
    %c0_i32_0 = arith.constant 0 : i32
    %c0_i32_1 = arith.constant 0 : i32
    return %c0_i32, %c0_i32_0 : i32, i32
  }
  func.func @transform_4(%arg0: i32) -> (i32, i32) {
    %c0_i32 = arith.constant 0 : i32
    %c0_i32_0 = arith.constant 0 : i32
    %c0_i32_1 = arith.constant 0 : i32
    return %c0_i32, %c0_i32_0 : i32, i32
  }
  func.func @transform_5(%arg0: i32) -> (i32, i32) {
    %c0_i32 = arith.constant 0 : i32
    %c0_i32_0 = arith.constant 0 : i32
    return %arg0, %c0_i32 : i32, i32
  }
}

</mosaic_0001>

<bundles_post_ra>
// kernel: tpu_custom_call.1
= control target key start
LH: loop header
LB: loop body
LE: loop exit
PB: predicated region body
PF: predicated region fallthrough
CT: control target
= control target key end

     0   :  { %10 = vsyncpa [#allocation3], 0  ;;  %s3553_s0 = inlined_call_operand.vmem [shape: s32[128,1], index: 0, kind: input, shape index: {}]   ;;  %s3554_s1 = inlined_call_operand.hbm [shape: f32[128,1152], index: 1, kind: input, shape index: {}]   ;;  %s3555_s2 = inlined_call_operand.vmem [shape: f32[1,384], index: 2, kind: input, shape index: {}]   ;;  %s3556_s3 = inlined_call_operand.hbm [shape: f32[384,256], index: 3, kind: input, shape index: {}]   ;;  %s3557_s4 = inlined_call_operand.vmem [shape: f32[1,256], index: 4, kind: input, shape index: {}]   ;;  %s3558_s5 = inlined_call_operand.hbm [shape: f32[8,128], index: 5, kind: output, shape index: {}]  }
   0x1   :  { %11 = vsyncpa [#allocation6], 0 }
   0x2   :  { %12 = vsyncpa [#allocation4], 0  ;;  %s2706_s18 = smov [#allocation2]   ;;  %s2634_s22 = scalar_lea.hbm %s3554_s1, 18432 }
   0x3   :  { %s20_s19 = sshll.u32 %s2706_s18, 4  ;;  %p2635_p0 = scmp.ne.s32.totalorder %s3554_s1, %s2634_s22  ;;  %s21_s19 = int_to_ptr.vmem [resolvable:$true] %s20_s19 }
   0x4   :  { %p2638_p1 = scmp.lt.u32.totalorder %s2634_s22, %s3554_s1 }
   0x6   :  { %p2640_p2 = pnand %p2638_p1, %p2635_p0 }
   0x8   :  { %2643 = shalt.err (!%p2640_p2)
}
   0x9   :  { %s2644_s27 = scalar_lea.vmem %s21_s19, 18432  ;;  %p2649_p4 = scmp.lt.s32.totalorder %s21_s19, %s21_s19 }
   0xa   :  { %p2645_p3 = scmp.ne.s32.totalorder %s21_s19, %s2644_s27  ;;  %p2650_p5 = scmp.lt.s32.totalorder %s2644_s27, %s2644_s27 }
   0xc   :  { %p2651_p6 = por %p2650_p5, %p2649_p4 }
   0xe   :  { %p2652_p7 = pnand %p2651_p6, %p2645_p3 }
  0x10   :  { %2655 = shalt.err (!%p2652_p7)
}
  0x11   :  { %s2707_s28 = smov 1152   ;;  %s2708_s29 = smov 72  }
  0x12   :  { %26 = dma.hbm_to_vmem [thread:$0]  %s3554_s1, 18432, %s21_s19, [#allocation3], %s2707_s28, %s2707_s28, %s2708_s29  }
  0x13   :  { %s2709_s7 = smov [#allocation5]   ;;  %s2656_s11 = scalar_lea.hbm %s3556_s3, 12288 }
  0x14   :  { %s34_s8 = sshll.u32 %s2709_s7, 4  ;;  %p2657_p8 = scmp.ne.s32.totalorder %s3556_s3, %s2656_s11  ;;  %s35_s8 = int_to_ptr.vmem [resolvable:$true] %s34_s8 }
  0x15   :  { %p2660_p9 = scmp.lt.u32.totalorder %s2656_s11, %s3556_s3 }
  0x17   :  { %p2662_p10 = pnand %p2660_p9, %p2657_p8 }
  0x19   :  { %2665 = shalt.err (!%p2662_p10)
}
  0x1a   :  { %s2666_s16 = scalar_lea.vmem %s35_s8, 12288  ;;  %p2671_p12 = scmp.lt.s32.totalorder %s35_s8, %s35_s8 }
  0x1b   :  { %p2667_p11 = scmp.ne.s32.totalorder %s35_s8, %s2666_s16  ;;  %p2672_p13 = scmp.lt.s32.totalorder %s2666_s16, %s2666_s16 }
  0x1d   :  { %p2673_p0 = por %p2672_p13, %p2671_p12 }
  0x1f   :  { %p2674_p1 = pnand %p2673_p0, %p2667_p11 }
  0x21   :  { %2677 = shalt.err (!%p2674_p1)
}
  0x22   :  { %s2710_s1 = smov 256   ;;  %s2711_s17 = smov 16  }
  0x23   :  { %40 = dma.hbm_to_vmem [thread:$0]  %s3556_s3, 12288, %s35_s8, [#allocation6], %s2710_s1, %s2710_s1, %s2711_s17  }
  0x24   :  { %2700 = dma.done.wait [#allocation3], 18432  }
  0x25   :  { %2701 = vsyncadd [#allocation3], 4294948864 }
  0x26   :  { %2702 = dma.done.wait [#allocation6], 12288  }
  0x27   :  { %2703 = vsyncadd [#allocation6], 4294955008  ;;  %v2712_v0 = vmov 0   ;;  %v51_v1 = vld [vmem:[%s3553_s0 + $0x10] sm:$0xff]  ;;  %v49_v2 = vld [vmem:[%s3553_s0] sm:$0xff]  ;;  %v2713_v5 = vmov 0.0  }
  0x28   :  { %2629 = vset.pattern.permute.xlu1 %v2712_v0  ;;  %2628 = vset.pattern.permute.xlu0 %v2712_v0  ;;  %v52_v3 = vld [vmem:[%s3553_s0 + $0x18] sm:$0xff]  ;;  %v50_v4 = vld [vmem:[%s3553_s0 + $0x8] sm:$0xff]  ;;  %v53_v7 = vld [vmem:[%s3553_s0 + $0x20] sm:$0xff]  ;;  %s2715_s30 = smov [#allocation7]  }
  0x29   :  { %74 = vperm.xlu1 %2629, %v51_v1   ;;  %68 = vperm.xlu0 %2628, %v49_v2   ;;  %v54_v6 = vld [vmem:[%s3553_s0 + $0x28] sm:$0xff]  ;;  %v173_v9 = vld [vmem:[#allocation2 + $0x50] sm:$0xff]  ;;  %v163_v11 = vld [vmem:[#allocation2] sm:$0xff]  ;;  %s2160_s6 = sshll.u32 %s2715_s30, 4  ;;  %s2161_s6 = int_to_ptr.vmem [resolvable:$true] %s2160_s6 }
  0x2a   :  { %371 = vmatprep.mubr.f32.mxu0 %v2713_v5  ;;  %532 = vmatprep.mubr.f32.mxu1 %v2713_v5  ;;  %v164_v8 = vld [vmem:[#allocation2 + $0x8] sm:$0xff]  ;;  %v166_v13 = vld [vmem:[#allocation2 + $0x18] sm:$0xff]  ;;  %v175_v15 = vld [vmem:[#allocation2 + $0x60] sm:$0xff]  ;;  %p2683_p3 = scmp.lt.s32.totalorder %s2161_s6, %s2161_s6 }
  0x2b   :  { %v2358_v10 = vpack.c.bf16 %v173_v9, %v164_v8  ;;  %v172_v12 = vld [vmem:[#allocation2 + $0x48] sm:$0xff]  ;;  %v165_v16 = vld [vmem:[#allocation2 + $0x10] sm:$0xff]  ;;  %v174_v17 = vld [vmem:[#allocation2 + $0x58] sm:$0xff]  ;;  %v2390_v20 = vpack.c.bf16 %v175_v15, %v166_v13 }
  0x2c   :  { %v2360_v14 = vpack.c.bf16 %v172_v12, %v163_v11  ;;  %v56_v18 = vld [vmem:[%s3553_s0 + $0x38] sm:$0xff]  ;;  %v55_v19 = vld [vmem:[%s3553_s0 + $0x30] sm:$0xff]  ;;  %v2392_v21 = vpack.c.bf16 %v174_v17, %v165_v16  ;;  %v191_v23 = vld [vmem:[#allocation2 + $0xe0] sm:$0xff] }
  0x2d   :  { %77 = vperm.xlu1 %2629, %v52_v3   ;;  %71 = vperm.xlu0 %2628, %v50_v4   ;;  %v182_v22 = vld [vmem:[#allocation2 + $0x98] sm:$0xff]  ;;  %v181_v24 = vld [vmem:[#allocation2 + $0x90] sm:$0xff]  ;;  %v184_v27 = vld [vmem:[#allocation2 + $0xa8] sm:$0xff] }
  0x2e   :  { %2359 = vmatprep.subr.bf16.mxu0 %v2358_v10  ;;  %v2362_v25 = vpack.c.bf16 %v191_v23, %v182_v22  ;;  %v190_v26 = vld [vmem:[#allocation2 + $0xd8] sm:$0xff]  ;;  %v193_v28 = vld [vmem:[#allocation2 + $0xf0] sm:$0xff]  ;;  %2391 = vmatprep.subr.bf16.mxu1 %v2390_v20  ;;  %v183_v31 = vld [vmem:[#allocation2 + $0xa0] sm:$0xff] }
  0x2f   :  { %2361 = vmatpush1.bf16.msra.mxu0 %v2360_v14  ;;  %v2364_v29 = vpack.c.bf16 %v190_v26, %v181_v24  ;;  %v2394_v30 = vpack.c.bf16 %v193_v28, %v184_v27  ;;  %v192_v32 = vld [vmem:[#allocation2 + $0xe8] sm:$0xff]  ;;  %2393 = vmatpush1.bf16.msra.mxu1 %v2392_v21  ;;  %v209_v35 = vld [vmem:[#allocation2 + $0x170] sm:$0xff]  ;;  %v199_v36 = vld [vmem:[#allocation2 + $0x120] sm:$0xff] }
  0x30   :  { %v200_v33 = vld [vmem:[#allocation2 + $0x128] sm:$0xff]  ;;  %2363 = vmatprep.subr.bf16.mxu0 %v2362_v25  ;;  %v2396_v34 = vpack.c.bf16 %v192_v32, %v183_v31  ;;  %v202_v40 = vld [vmem:[#allocation2 + $0x138] sm:$0xff]  ;;  %v211_v41 = vld [vmem:[#allocation2 + $0x180] sm:$0xff] }
  0x31   :  { %83 = vperm.xlu1 %2629, %v54_v6   ;;  %80 = vperm.xlu0 %2628, %v53_v7   ;;  %v208_v37 = vld [vmem:[#allocation2 + $0x168] sm:$0xff]  ;;  %v2366_v39 = vpack.c.bf16 %v209_v35, %v200_v33  ;;  %v201_v42 = vld [vmem:[#allocation2 + $0x130] sm:$0xff]  ;;  %v2398_v43 = vpack.c.bf16 %v211_v41, %v202_v40  ;;  %v210_v44 = vld [vmem:[#allocation2 + $0x178] sm:$0xff] }
  0x32   :  { %v58_v38 = vld [vmem:[%s3553_s0 + $0x48] sm:$0xff]  ;;  %2395 = vmatprep.subr.bf16.mxu1 %v2394_v30  ;;  %v218_v45 = vld [vmem:[#allocation2 + $0x1b8] sm:$0xff]  ;;  %v227_v46 = vld [vmem:[#allocation2 + $0x200] sm:$0xff]  ;;  %v2368_v48 = vpack.c.bf16 %v208_v37, %v199_v36  ;;  %v2400_v51 = vpack.c.bf16 %v210_v44, %v201_v42 }
  0x33   :  { %v57_v47 = vld [vmem:[%s3553_s0 + $0x40] sm:$0xff]  ;;  %2365 = vmatpush1.bf16.msra.mxu0 %v2364_v29  ;;  %v217_v49 = vld [vmem:[#allocation2 + $0x1b0] sm:$0xff]  ;;  %v220_v50 = vld [vmem:[#allocation2 + $0x1c8] sm:$0xff]  ;;  %2397 = vmatpush1.bf16.msra.mxu1 %v2396_v34  ;;  %v2370_v52 = vpack.c.bf16 %v227_v46, %v218_v45 }
  0x34   :  { %2367 = vmatprep.subr.bf16.mxu0 %v2366_v39  ;;  %v226_v53 = vld [vmem:[#allocation2 + $0x1f8] sm:$0xff]  ;;  %v229_v54 = vld [vmem:[#allocation2 + $0x210] sm:$0xff]  ;;  %v219_v55 = vld [vmem:[#allocation2 + $0x1c0] sm:$0xff]  ;;  %2399 = vmatprep.subr.bf16.mxu1 %v2398_v43 }
  0x35   :  { %89 = vperm.xlu1 %2629, %v56_v18   ;;  %86 = vperm.xlu0 %2628, %v55_v19   ;;  %v2402_v56 = vpack.c.bf16 %v229_v54, %v220_v50  ;;  %v228_v57 = vld [vmem:[#allocation2 + $0x208] sm:$0xff]  ;;  %v245_v59 = vld [vmem:[#allocation2 + $0x290] sm:$0xff]  ;;  %v238_v60 = vld [vmem:[#allocation2 + $0x258] sm:$0xff]  ;;  %v2372_v0 = vpack.c.bf16 %v226_v53, %v217_v49 }
  0x36   :  { %v236_v58 = vld [vmem:[#allocation2 + $0x248] sm:$0xff]  ;;  %v247_v61 = vld [vmem:[#allocation2 + $0x2a0] sm:$0xff]  ;;  %v60_v62 = vld [vmem:[%s3553_s0 + $0x58] sm:$0xff]  ;;  %v2404_v1 = vpack.c.bf16 %v228_v57, %v219_v55  ;;  %v3559_v57 = vlaneseq }
  0x37   :  { %v59_v63 = vld [vmem:[%s3553_s0 + $0x50] sm:$0xff]  ;;  %2369 = vmatpush1.bf16.msra.mxu0 %v2368_v48  ;;  %2401 = vmatpush1.bf16.msra.mxu1 %v2400_v51  ;;  %v2374_v2 = vpack.c.bf16 %v245_v59, %v236_v58  ;;  %v235_v3 = vld [vmem:[#allocation2 + $0x240] sm:$0xff]  ;;  %v244_v4 = vld [vmem:[#allocation2 + $0x288] sm:$0xff]  ;;  %v2406_v7 = vpack.c.bf16 %v247_v61, %v238_v60 }
  0x38   :  { %2371 = vmatprep.subr.bf16.mxu0 %v2370_v52  ;;  %v237_v6 = vld [vmem:[#allocation2 + $0x250] sm:$0xff]  ;;  %2403 = vmatprep.subr.bf16.mxu1 %v2402_v56  ;;  %v246_v8 = vld [vmem:[#allocation2 + $0x298] sm:$0xff]  ;;  %v263_v10 = vld [vmem:[#allocation2 + $0x320] sm:$0xff]  ;;  %v2376_v15 = vpack.c.bf16 %v244_v4, %v235_v3  ;;  %v2821_v60 = vand.u32 127, %v3559_v57 }
  0x39   :  { %95 = vperm.xlu1 %2629, %v58_v38   ;;  %92 = vperm.xlu0 %2628, %v57_v47   ;;  %v254_v9 = vld [vmem:[#allocation2 + $0x2d8] sm:$0xff]  ;;  %v256_v11 = vld [vmem:[#allocation2 + $0x2e8] sm:$0xff]  ;;  %v265_v12 = vld [vmem:[#allocation2 + $0x330] sm:$0xff]  ;;  %v2408_v16 = vpack.c.bf16 %v246_v8, %v237_v6 }
  0x3a   :  { %v62_v13 = vld [vmem:[%s3553_s0 + $0x68] sm:$0xff]  ;;  %v61_v14 = vld [vmem:[%s3553_s0 + $0x60] sm:$0xff]  ;;  %v2378_v17 = vpack.c.bf16 %v263_v10, %v254_v9  ;;  %v253_v18 = vld [vmem:[#allocation2 + $0x2d0] sm:$0xff]  ;;  %v2410_v21 = vpack.c.bf16 %v265_v12, %v256_v11  ;;  %v2714_v12 = vmov 1.0  }
  0x3b   :  { %2373 = vmatpush1.bf16.msra.mxu0 %v2372_v0  ;;  %2405 = vmatpush1.bf16.msra.mxu1 %v2404_v1  ;;  %v262_v19 = vld [vmem:[#allocation2 + $0x318] sm:$0xff]  ;;  %v255_v20 = vld [vmem:[#allocation2 + $0x2e0] sm:$0xff]  ;;  %v264_v22 = vld [vmem:[#allocation2 + $0x328] sm:$0xff] }
  0x3c   :  { %2375 = vmatprep.subr.bf16.mxu0 %v2374_v2  ;;  %2407 = vmatprep.subr.bf16.mxu1 %v2406_v7  ;;  %v272_v23 = vld [vmem:[#allocation2 + $0x368] sm:$0xff]  ;;  %v281_v24 = vld [vmem:[#allocation2 + $0x3b0] sm:$0xff]  ;;  %v274_v25 = vld [vmem:[#allocation2 + $0x378] sm:$0xff]  ;;  %v2380_v29 = vpack.c.bf16 %v262_v19, %v253_v18  ;;  %v2412_v30 = vpack.c.bf16 %v264_v22, %v255_v20 }
  0x3d   :  { %101 = vperm.xlu1 %2629, %v60_v62   ;;  %98 = vperm.xlu0 %2628, %v59_v63   ;;  %v283_v26 = vld [vmem:[#allocation2 + $0x3c0] sm:$0xff]  ;;  %v64_v27 = vld [vmem:[%s3553_s0 + $0x78] sm:$0xff]  ;;  %v63_v28 = vld [vmem:[%s3553_s0 + $0x70] sm:$0xff]  ;;  %v2382_v31 = vpack.c.bf16 %v281_v24, %v272_v23 }
  0x3e   :  { %v271_v32 = vld [vmem:[#allocation2 + $0x360] sm:$0xff]  ;;  %v280_v33 = vld [vmem:[#allocation2 + $0x3a8] sm:$0xff]  ;;  %v273_v34 = vld [vmem:[#allocation2 + $0x370] sm:$0xff]  ;;  %v2414_v35 = vpack.c.bf16 %v283_v26, %v274_v25 }
  0x3f   :  { %2377 = vmatpush1.bf16.msra.mxu0 %v2376_v15  ;;  %2409 = vmatpush1.bf16.msra.mxu1 %v2408_v16  ;;  %v282_v36 = vld [vmem:[#allocation2 + $0x3b8] sm:$0xff]  ;;  %v299_v38 = vld [vmem:[#allocation2 + $0x440] sm:$0xff]  ;;  %v292_v39 = vld [vmem:[#allocation2 + $0x408] sm:$0xff]  ;;  %v2384_v41 = vpack.c.bf16 %v280_v33, %v271_v32 }
  0x40   :  { %2379 = vmatprep.subr.bf16.mxu0 %v2378_v17  ;;  %2411 = vmatprep.subr.bf16.mxu1 %v2410_v21  ;;  %v290_v37 = vld [vmem:[#allocation2 + $0x3f8] sm:$0xff]  ;;  %v301_v40 = vld [vmem:[#allocation2 + $0x450] sm:$0xff]  ;;  %v2416_v42 = vpack.c.bf16 %v282_v36, %v273_v34  ;;  %v291_v46 = vld [vmem:[#allocation2 + $0x400] sm:$0xff] }
  0x41   :  { %107 = vperm.xlu1 %2629, %v62_v13   ;;  %104 = vperm.xlu0 %2628, %v61_v14   ;;  %v2386_v43 = vpack.c.bf16 %v299_v38, %v290_v37  ;;  %v289_v44 = vld [vmem:[#allocation2 + $0x3f0] sm:$0xff]  ;;  %v298_v45 = vld [vmem:[#allocation2 + $0x438] sm:$0xff]  ;;  %v2418_v47 = vpack.c.bf16 %v301_v40, %v292_v39  ;;  %v300_v48 = vld [vmem:[#allocation2 + $0x448] sm:$0xff] }
  0x42   :  { %v168_v49 = vld [vmem:[#allocation2 + $0x28] sm:$0xff]  ;;  %v177_v50 = vld [vmem:[#allocation2 + $0x70] sm:$0xff]  ;;  %v170_v51 = vld [vmem:[#allocation2 + $0x38] sm:$0xff]  ;;  %v2388_v53 = vpack.c.bf16 %v298_v45, %v289_v44  ;;  %v2420_v54 = vpack.c.bf16 %v300_v48, %v291_v46 }
  0x43   :  { %2381 = vmatpush1.bf16.msra.mxu0 %v2380_v29  ;;  %2413 = vmatpush1.bf16.msra.mxu1 %v2412_v30  ;;  %v179_v52 = vld [vmem:[#allocation2 + $0x80] sm:$0xff]  ;;  %v2422_v55 = vpack.c.bf16 %v177_v50, %v168_v49  ;;  %v176_v59 = vld [vmem:[#allocation2 + $0x68] sm:$0xff]  ;;  %v186_v61 = vld [vmem:[#allocation2 + $0xb8] sm:$0xff] }
  0x44   :  { %2383 = vmatprep.subr.bf16.mxu0 %v2382_v31  ;;  %2415 = vmatprep.subr.bf16.mxu1 %v2414_v35  ;;  %v2454_v56 = vpack.c.bf16 %v179_v52, %v170_v51  ;;  %v167_v58 = vld [vmem:[#allocation2 + $0x20] sm:$0xff]  ;;  %v169_v63 = vld [vmem:[#allocation2 + $0x30] sm:$0xff]  ;;  %v178_v0 = vld [vmem:[#allocation2 + $0x78] sm:$0xff] }
  0x45   :  { %113 = vperm.xlu1 %2629, %v64_v27   ;;  %110 = vperm.xlu0 %2628, %v63_v28   ;;  %v195_v62 = vld [vmem:[#allocation2 + $0x100] sm:$0xff]  ;;  %v2424_v1 = vpack.c.bf16 %v176_v59, %v167_v58  ;;  %v185_v4 = vld [vmem:[#allocation2 + $0xb0] sm:$0xff]  ;;  %v194_v6 = vld [vmem:[#allocation2 + $0xf8] sm:$0xff]  ;;  %v2456_v9 = vpack.c.bf16 %v178_v0, %v169_v63 }
  0x46   :  { %v2426_v3 = vpack.c.bf16 %v195_v62, %v186_v61  ;;  %v204_v8 = vld [vmem:[#allocation2 + $0x148] sm:$0xff]  ;;  %v197_v11 = vld [vmem:[#allocation2 + $0x110] sm:$0xff]  ;;  %v187_v14 = vld [vmem:[#allocation2 + $0xc0] sm:$0xff]  ;;  %v2428_v17 = vpack.c.bf16 %v194_v6, %v185_v4 }
  0x47   :  { %2385 = vmatpush1.bf16.msra.mxu0 %v2384_v41  ;;  %2417 = vmatpush1.bf16.msra.mxu1 %v2416_v42  ;;  %v188_v10 = vld [vmem:[#allocation2 + $0xc8] sm:$0xff]  ;;  %v213_v13 = vld [vmem:[#allocation2 + $0x190] sm:$0xff]  ;;  %v203_v18 = vld [vmem:[#allocation2 + $0x140] sm:$0xff] }
  0x48   :  { %2387 = vmatprep.subr.bf16.mxu0 %v2386_v43  ;;  %2419 = vmatprep.subr.bf16.mxu1 %v2418_v47  ;;  %v196_v15 = vld [vmem:[#allocation2 + $0x108] sm:$0xff]  ;;  %v2458_v20 = vpack.c.bf16 %v197_v11, %v188_v10  ;;  %v2430_v22 = vpack.c.bf16 %v213_v13, %v204_v8  ;;  %v222_v23 = vld [vmem:[#allocation2 + $0x1d8] sm:$0xff]  ;;  %v215_v26 = vld [vmem:[#allocation2 + $0x1a0] sm:$0xff] }
  0x49   :  { %v212_v19 = vld [vmem:[#allocation2 + $0x188] sm:$0xff]  ;;  %v2460_v24 = vpack.c.bf16 %v196_v15, %v187_v14  ;;  %v206_v25 = vld [vmem:[#allocation2 + $0x158] sm:$0xff]  ;;  %v231_v28 = vld [vmem:[#allocation2 + $0x220] sm:$0xff] }
  0x4a   :  { %v205_v29 = vld [vmem:[#allocation2 + $0x150] sm:$0xff]  ;;  %v214_v30 = vld [vmem:[#allocation2 + $0x198] sm:$0xff]  ;;  %v2432_v32 = vpack.c.bf16 %v212_v19, %v203_v18  ;;  %v2462_v35 = vpack.c.bf16 %v215_v26, %v206_v25  ;;  %v2434_v36 = vpack.c.bf16 %v231_v28, %v222_v23  ;;  %v240_v37 = vld [vmem:[#allocation2 + $0x268] sm:$0xff] }
  0x4b   :  { %2389 = vmatpush1.bf16.msra.mxu0 %v2388_v53  ;;  %2421 = vmatpush1.bf16.msra.mxu1 %v2420_v54  ;;  %v221_v33 = vld [vmem:[#allocation2 + $0x1d0] sm:$0xff]  ;;  %v230_v34 = vld [vmem:[#allocation2 + $0x218] sm:$0xff]  ;;  %v2464_v38 = vpack.c.bf16 %v214_v30, %v205_v29  ;;  %v224_v39 = vld [vmem:[#allocation2 + $0x1e8] sm:$0xff] }
  0x4c   :  { %2423 = vmatprep.subr.bf16.mxu0 %v2422_v55  ;;  %2455 = vmatprep.subr.bf16.mxu1 %v2454_v56  ;;  %v233_v40 = vld [vmem:[#allocation2 + $0x230] sm:$0xff]  ;;  %v223_v42 = vld [vmem:[#allocation2 + $0x1e0] sm:$0xff]  ;;  %v232_v43 = vld [vmem:[#allocation2 + $0x228] sm:$0xff]  ;;  %v2436_v45 = vpack.c.bf16 %v230_v34, %v221_v33 }
  0x4d   :  { %v249_v41 = vld [vmem:[#allocation2 + $0x2b0] sm:$0xff]  ;;  %v239_v46 = vld [vmem:[#allocation2 + $0x260] sm:$0xff]  ;;  %v248_v47 = vld [vmem:[#allocation2 + $0x2a8] sm:$0xff]  ;;  %v2466_v48 = vpack.c.bf16 %v233_v40, %v224_v39  ;;  %v2468_v52 = vpack.c.bf16 %v232_v43, %v223_v42 }
  0x4e   :  { %v2438_v50 = vpack.c.bf16 %v249_v41, %v240_v37  ;;  %v258_v51 = vld [vmem:[#allocation2 + $0x2f8] sm:$0xff]  ;;  %v251_v54 = vld [vmem:[#allocation2 + $0x2c0] sm:$0xff]  ;;  %v241_v58 = vld [vmem:[#allocation2 + $0x270] sm:$0xff]  ;;  %v2440_v61 = vpack.c.bf16 %v248_v47, %v239_v46 }
  0x4f   :  { %v242_v53 = vld [vmem:[#allocation2 + $0x278] sm:$0xff]  ;;  %v267_v56 = vld [vmem:[#allocation2 + $0x340] sm:$0xff]  ;;  %v257_v62 = vld [vmem:[#allocation2 + $0x2f0] sm:$0xff] }
  0x50   :  { %v250_v59 = vld [vmem:[#allocation2 + $0x2b8] sm:$0xff]  ;;  %v2470_v0 = vpack.c.bf16 %v251_v54, %v242_v53  ;;  %v260_v6 = vld [vmem:[#allocation2 + $0x308] sm:$0xff]  ;;  %v269_v8 = vld [vmem:[#allocation2 + $0x350] sm:$0xff] }
  0x51   :  { %v266_v63 = vld [vmem:[#allocation2 + $0x338] sm:$0xff]  ;;  %v2472_v4 = vpack.c.bf16 %v250_v59, %v241_v58  ;;  %v285_v10 = vld [vmem:[#allocation2 + $0x3d0] sm:$0xff]  ;;  %v259_v11 = vld [vmem:[#allocation2 + $0x300] sm:$0xff] }
  0x52   :  { %v268_v13 = vld [vmem:[#allocation2 + $0x348] sm:$0xff]  ;;  %v2444_v14 = vpack.c.bf16 %v266_v63, %v257_v62  ;;  %v275_v15 = vld [vmem:[#allocation2 + $0x380] sm:$0xff]  ;;  %v278_v23 = vld [vmem:[#allocation2 + $0x398] sm:$0xff] }
  0x53   :  { %v303_v26 = vld [vmem:[#allocation2 + $0x460] sm:$0xff]  ;;  %v286_v28 = vld [vmem:[#allocation2 + $0x3d8] sm:$0xff]  ;;  %v293_v30 = vld [vmem:[#allocation2 + $0x410] sm:$0xff] }
  0x54   :  { %v296_v37 = vld [vmem:[#allocation2 + $0x428] sm:$0xff]  ;;  %v295_v39 = vld [vmem:[#allocation2 + $0x420] sm:$0xff]  ;;  %v1898_v21 = vld [vmem:[#allocation5 + $0x18] sm:$0xff] }
  0x55   :  { %v304_v41 = vld [vmem:[#allocation2 + $0x468] sm:$0xff]  ;;  %v171_v42 = vld [vmem:[#allocation2 + $0x40] sm:$0xff]  ;;  %v1909_v46 = vld [vmem:[#allocation5 + $0x70] sm:$0xff] }
  0x56   :  { %v180_v43 = vld [vmem:[#allocation2 + $0x88] sm:$0xff]  ;;  %v2484_v47 = vpack.c.bf16 %v304_v41, %v295_v39  ;;  %v1895_v49 = vld [vmem:[#allocation5] sm:$0xff]  ;;  %v1913_v53 = vld [vmem:[#allocation5 + $0x90] sm:$0xff] }
  0x57   :  { %v1896_v7 = vld [vmem:[#allocation5 + $0x8] sm:$0xff]  ;;  %v1899_v34 = vld [vmem:[#allocation5 + $0x20] sm:$0xff] }
  0x58   :  { %v2518_v31 = vpack.c.bf16 %v1898_v21, %v1896_v7  ;;  %v1920_v63 = vld [vmem:[#allocation5 + $0xc8] sm:$0xff]  ;;  %v1935_v21 = vld [vmem:[#allocation5 + $0x140] sm:$0xff] }
  0xa8   :  { %v69_v2 = vpop.permute.xlu0 %68  ;;  %v75_v27 = vpop.permute.xlu1 %74 }
  0xa9   :  { %vm2824_vm0 = vcmp.eq.s32.totalorder %v2821_v60, %v69_v2  ;;  %vm2848_vm2 = vcmp.eq.s32.totalorder %v2821_v60, %v75_v27  ;;  %v2442_v2 = vpack.c.bf16 %v267_v56, %v258_v51  ;;  %v277_v27 = vld [vmem:[#allocation2 + $0x390] sm:$0xff] }
  0xaa   :  { %2186 = vmatmul.mubr.msk.f32.vlgmr.msra.gmra.mrb[0].mxu0 %vm2824_vm0, %v2714_v12  ;;  %2202 = vmatmul.mubr.msk.f32.vlgmr.msra.gmra.mrb[0].mxu1 %vm2824_vm0, %v2714_v12 }
  0xab   :  { %2425 = vmatpush1.bf16.msra.mxu0 %v2424_v1  ;;  %377 = vmatprep.mubr.f32.mxu0 %v2713_v5  ;;  %v1897_v1 = vld [vmem:[#allocation5 + $0x10] sm:$0xff] }
  0xac   :  { %v72_v16 = vpop.permute.xlu0 %71  ;;  %538 = vmatprep.mubr.f32.mxu1 %v2713_v5  ;;  %2427 = vmatprep.subr.bf16.mxu0 %v2426_v3  ;;  %v78_v44 = vpop.permute.xlu1 %77  ;;  %v276_v3 = vld [vmem:[#allocation2 + $0x388] sm:$0xff]  ;;  %v2520_v18 = vpack.c.bf16 %v1897_v1, %v1895_v49 }
  0xad   :  { %vm2837_vm1 = vcmp.eq.s32.totalorder %v2821_v60, %v72_v16  ;;  %2457 = vmatpush1.bf16.msra.mxu1 %v2456_v9  ;;  %vm2863_vm3 = vcmp.eq.s32.totalorder %v2821_v60, %v78_v44  ;;  %v284_v16 = vld [vmem:[#allocation2 + $0x3c8] sm:$0xff]  ;;  %v2446_v19 = vpack.c.bf16 %v285_v10, %v276_v3 }
  0xae   :  { %2187 = vmatmul.mubr.msk.f32.gmra.mrb[2].mxu0 %vm2837_vm1, %v2714_v12  ;;  %2203 = vmatmul.mubr.msk.f32.gmra.mrb[2].mxu1 %vm2837_vm1, %v2714_v12  ;;  %v2448_v29 = vpack.c.bf16 %v284_v16, %v275_v15  ;;  %v216_v10 = vld [vmem:[#allocation2 + $0x1a8] sm:$0xff]  ;;  %v243_v16 = vld [vmem:[#allocation2 + $0x280] sm:$0xff] }
  0xaf   :  { %383 = vmatprep.mubr.f32.mxu0 %v2713_v5  ;;  %544 = vmatprep.mubr.f32.mxu1 %v2713_v5 }
  0xb0   :  { %2429 = vmatpush1.bf16.msra.mxu0 %v2428_v17  ;;  %2459 = vmatprep.subr.bf16.mxu1 %v2458_v20  ;;  %v81_v55 = vpop.permute.xlu0 %80  ;;  %v84_v9 = vpop.permute.xlu1 %83  ;;  %v2474_v17 = vpack.c.bf16 %v269_v8, %v260_v6  ;;  %v2476_v20 = vpack.c.bf16 %v268_v13, %v259_v11  ;;  %v189_v6 = vld [vmem:[#allocation2 + $0xd0] sm:$0xff]  ;;  %v198_v8 = vld [vmem:[#allocation2 + $0x118] sm:$0xff] }
  0xb1   :  { %2431 = vmatprep.subr.bf16.mxu0 %v2430_v22  ;;  %2461 = vmatpush1.bf16.msra.mxu1 %v2460_v24  ;;  %vm2876_vm4 = vcmp.eq.s32.totalorder %v2821_v60, %v81_v55  ;;  %vm2889_vm5 = vcmp.eq.s32.totalorder %v2821_v60, %v84_v9  ;;  %v294_v22 = vld [vmem:[#allocation2 + $0x418] sm:$0xff]  ;;  %v287_v24 = vld [vmem:[#allocation2 + $0x3e0] sm:$0xff]  ;;  %v2490_v9 = vpack.c.bf16 %v198_v8, %v189_v6  ;;  %v225_v13 = vld [vmem:[#allocation2 + $0x1f0] sm:$0xff] }
  0xb2   :  { %2188 = vmatmul.mubr.msk.f32.gmra.mrb[4].mxu0 %vm2848_vm2, %v2714_v12  ;;  %2204 = vmatmul.mubr.msk.f32.gmra.mrb[4].mxu1 %vm2848_vm2, %v2714_v12  ;;  %v2478_v33 = vpack.c.bf16 %v287_v24, %v278_v23  ;;  %v279_v24 = vld [vmem:[#allocation2 + $0x3a0] sm:$0xff]  ;;  %v1916_v55 = vld [vmem:[#allocation5 + $0xa8] sm:$0xff] }
  0xb3   :  { %389 = vmatprep.mubr.f32.mxu0 %v2713_v5  ;;  %550 = vmatprep.mubr.f32.mxu1 %v2713_v5  ;;  %v1924_v8 = vld [vmem:[#allocation5 + $0xe8] sm:$0xff] }
  0xb4   :  { %2433 = vmatpush1.bf16.msra.mxu0 %v2432_v32  ;;  %2463 = vmatprep.subr.bf16.mxu1 %v2462_v35  ;;  %v87_v25 = vpop.permute.xlu0 %86  ;;  %v302_v32 = vld [vmem:[#allocation2 + $0x458] sm:$0xff]  ;;  %v2450_v35 = vpack.c.bf16 %v303_v26, %v294_v22  ;;  %v90_v40 = vpop.permute.xlu1 %89 }
  0xb5   :  { %2435 = vmatprep.subr.bf16.mxu0 %v2434_v36  ;;  %2465 = vmatpush1.bf16.msra.mxu1 %v2464_v38  ;;  %vm2902_vm6 = vcmp.eq.s32.totalorder %v2821_v60, %v87_v25  ;;  %v2480_v36 = vpack.c.bf16 %v286_v28, %v277_v27  ;;  %v305_v38 = vld [vmem:[#allocation2 + $0x470] sm:$0xff]  ;;  %v2452_v44 = vpack.c.bf16 %v302_v32, %v293_v30  ;;  %v270_v22 = vld [vmem:[#allocation2 + $0x358] sm:$0xff]  ;;  %v288_v25 = vld [vmem:[#allocation2 + $0x3e8] sm:$0xff] }
  0xb6   :  { %2189 = vmatmul.mubr.msk.f32.gmra.mrb[6].mxu0 %vm2863_vm3, %v2714_v12  ;;  %2205 = vmatmul.mubr.msk.f32.gmra.mrb[6].mxu1 %vm2863_vm3, %v2714_v12  ;;  %vm2915_vm7 = vcmp.eq.s32.totalorder %v2821_v60, %v90_v40  ;;  %v2510_v26 = vpack.c.bf16 %v288_v25, %v279_v24  ;;  %v297_v27 = vld [vmem:[#allocation2 + $0x430] sm:$0xff]  ;;  %v306_v28 = vld [vmem:[#allocation2 + $0x478] sm:$0xff]  ;;  %v1900_v30 = vld [vmem:[#allocation5 + $0x28] sm:$0xff] }
  0xb7   :  { %395 = vmatprep.mubr.f32.mxu0 %v2713_v5  ;;  %556 = vmatprep.mubr.f32.mxu1 %v2713_v5  ;;  %v1902_v32 = vld [vmem:[#allocation5 + $0x38] sm:$0xff]  ;;  %v1905_v40 = vld [vmem:[#allocation5 + $0x50] sm:$0xff]  ;;  %v1931_v25 = vld [vmem:[#allocation5 + $0x120] sm:$0xff] }
  0xb8   :  { %2437 = vmatpush1.bf16.msra.mxu0 %v2436_v45  ;;  %2467 = vmatprep.subr.bf16.mxu1 %v2466_v48  ;;  %v2482_v45 = vpack.c.bf16 %v305_v38, %v296_v37  ;;  %v2919_v48 = vpack.c.bf16 %v180_v43, %v171_v42  ;;  %v1904_v37 = vld [vmem:[#allocation5 + $0x48] sm:$0xff]  ;;  %v1906_v38 = vld [vmem:[#allocation5 + $0x58] sm:$0xff] }
  0xb9   :  { %2439 = vmatprep.subr.bf16.mxu0 %v2438_v50  ;;  %2469 = vmatpush1.bf16.msra.mxu1 %v2468_v52  ;;  %v93_v50 = vpop.permute.xlu0 %92  ;;  %v96_v52 = vpop.permute.xlu1 %95  ;;  %v2526_v39 = vpack.c.bf16 %v1906_v38, %v1904_v37  ;;  %v1908_v42 = vld [vmem:[#allocation5 + $0x68] sm:$0xff]  ;;  %v1910_v43 = vld [vmem:[#allocation5 + $0x78] sm:$0xff]  ;;  %v1941_v37 = vld [vmem:[#allocation5 + $0x170] sm:$0xff] }
  0xba   :  { %2190 = vmatmul.mubr.msk.f32.gmra.mrb[8].mxu0 %vm2876_vm4, %v2714_v12  ;;  %2206 = vmatmul.mubr.msk.f32.gmra.mrb[8].mxu1 %vm2876_vm4, %v2714_v12  ;;  %vm2930_vm8 = vcmp.eq.s32.totalorder %v2821_v60, %v93_v50  ;;  %vm2944_vm9 = vcmp.eq.s32.totalorder %v2821_v60, %v96_v52  ;;  %v1914_v50 = vld [vmem:[#allocation5 + $0x98] sm:$0xff]  ;;  %v1911_v52 = vld [vmem:[#allocation5 + $0x80] sm:$0xff] }
  0xbb   :  { %401 = vmatprep.mubr.f32.mxu0 %v2713_v5  ;;  %562 = vmatprep.mubr.f32.mxu1 %v2713_v5 }
  0xbc   :  { %2441 = vmatpush1.bf16.msra.mxu0 %v2440_v61  ;;  %2471 = vmatprep.subr.bf16.mxu1 %v2470_v0  ;;  %v1917_v61 = vld [vmem:[#allocation5 + $0xb0] sm:$0xff] }
  0xbd   :  { %2443 = vmatprep.subr.bf16.mxu0 %v2442_v2  ;;  %2473 = vmatpush1.bf16.msra.mxu1 %v2472_v4  ;;  %v99_v54 = vpop.permute.xlu0 %98  ;;  %v102_v56 = vpop.permute.xlu1 %101  ;;  %v1921_v4 = vld [vmem:[#allocation5 + $0xd0] sm:$0xff] }
  0xbe   :  { %2191 = vmatmul.mubr.msk.f32.gmra.mrb[10].mxu0 %vm2889_vm5, %v2714_v12  ;;  %2207 = vmatmul.mubr.msk.f32.gmra.mrb[10].mxu1 %vm2889_vm5, %v2714_v12  ;;  %vm2957_vm10 = vcmp.eq.s32.totalorder %v2821_v60, %v99_v54  ;;  %vm2970_vm11 = vcmp.eq.s32.totalorder %v2821_v60, %v102_v56  ;;  %v2536_v54 = vpack.c.bf16 %v1913_v53, %v1911_v52  ;;  %v1918_v56 = vld [vmem:[#allocation5 + $0xb8] sm:$0xff]  ;;  %v3212_v52 = vld [vmem:[%s3555_s2] ss:$0 sm:$0xff] }
  0xbf   :  { %407 = vmatprep.mubr.f32.mxu0 %v2713_v5  ;;  %568 = vmatprep.mubr.f32.mxu1 %v2713_v5  ;;  %v2538_v58 = vpack.c.bf16 %v1918_v56, %v1916_v55 }
  0xc0   :  { %2445 = vmatpush1.bf16.msra.mxu0 %v2444_v14  ;;  %2475 = vmatprep.subr.bf16.mxu1 %v2474_v17  ;;  %v234_v14 = vld [vmem:[#allocation2 + $0x238] sm:$0xff]  ;;  %v252_v17 = vld [vmem:[#allocation2 + $0x2c8] sm:$0xff] }
  0xc1   :  { %2447 = vmatprep.subr.bf16.mxu0 %v2446_v19  ;;  %2477 = vmatpush1.bf16.msra.mxu1 %v2476_v20  ;;  %v105_v59 = vpop.permute.xlu0 %104  ;;  %v108_v62 = vpop.permute.xlu1 %107  ;;  %v2498_v15 = vpack.c.bf16 %v234_v14, %v225_v13  ;;  %v2502_v19 = vpack.c.bf16 %v252_v17, %v243_v16  ;;  %v261_v20 = vld [vmem:[#allocation2 + $0x310] sm:$0xff]  ;;  %v1928_v14 = vld [vmem:[#allocation5 + $0x108] sm:$0xff]  ;;  %v1927_v17 = vld [vmem:[#allocation5 + $0x100] sm:$0xff] }
  0xc2   :  { %2192 = vmatmul.mubr.msk.f32.gmra.mrb[12].mxu0 %vm2902_vm6, %v2714_v12  ;;  %2208 = vmatmul.mubr.msk.f32.gmra.mrb[12].mxu1 %vm2902_vm6, %v2714_v12  ;;  %vm2983_vm12 = vcmp.eq.s32.totalorder %v2821_v60, %v105_v59  ;;  %vm2996_vm13 = vcmp.eq.s32.totalorder %v2821_v60, %v108_v62  ;;  %v2506_v23 = vpack.c.bf16 %v270_v22, %v261_v20  ;;  %v1915_v59 = vld [vmem:[#allocation5 + $0xa0] sm:$0xff]  ;;  %v1932_v22 = vld [vmem:[#allocation5 + $0x128] sm:$0xff] }
  0xc3   :  { %413 = vmatprep.mubr.f32.mxu0 %v2713_v5  ;;  %574 = vmatprep.mubr.f32.mxu1 %v2713_v5  ;;  %v2540_v62 = vpack.c.bf16 %v1917_v61, %v1915_v59 }
  0xc4   :  { %2449 = vmatpush1.bf16.msra.mxu0 %v2448_v29  ;;  %2479 = vmatprep.subr.bf16.mxu1 %v2478_v33  ;;  %v2514_v29 = vpack.c.bf16 %v306_v28, %v297_v27  ;;  %v2522_v33 = vpack.c.bf16 %v1902_v32, %v1900_v30  ;;  %v1936_v28 = vld [vmem:[#allocation5 + $0x148] sm:$0xff] }
  0xc5   :  { %2451 = vmatprep.subr.bf16.mxu0 %v2450_v35  ;;  %2481 = vmatpush1.bf16.msra.mxu1 %v2480_v36  ;;  %v111_v0 = vpop.permute.xlu0 %110  ;;  %v114_v3 = vpop.permute.xlu1 %113  ;;  %v1901_v35 = vld [vmem:[#allocation5 + $0x30] sm:$0xff] }
  0xc6   :  { %2193 = vmatmul.mubr.msk.f32.gmra.mrb[14].mxu0 %vm2915_vm7, %v2714_v12  ;;  %2209 = vmatmul.mubr.msk.f32.gmra.mrb[14].mxu1 %vm2915_vm7, %v2714_v12  ;;  %vm3009_vm14 = vcmp.eq.s32.totalorder %v2821_v60, %v111_v0  ;;  %vm3022_vm15 = vcmp.eq.s32.totalorder %v2821_v60, %v114_v3  ;;  %v207_v60 = vld [vmem:[#allocation2 + $0x160] sm:$0xff]  ;;  %v2524_v36 = vpack.c.bf16 %v1901_v35, %v1899_v34  ;;  %v1922_v0 = vld [vmem:[#allocation5 + $0xd8] sm:$0xff] }
  0xc7   :  { %419 = vmatprep.mubr.f32.mxu0 %v2713_v5  ;;  %580 = vmatprep.mubr.f32.mxu1 %v2713_v5  ;;  %v2494_v11 = vpack.c.bf16 %v216_v10, %v207_v60  ;;  %v2542_v2 = vpack.c.bf16 %v1922_v0, %v1920_v63  ;;  %v1919_v3 = vld [vmem:[#allocation5 + $0xc0] sm:$0xff]  ;;  %v1942_v34 = vld [vmem:[#allocation5 + $0x178] sm:$0xff] }
  0xc8   :  { %2453 = vmatpush1.bf16.msra.mxu0 %v2452_v44  ;;  %2483 = vmatprep.subr.bf16.mxu1 %v2482_v45  ;;  %v2530_v44 = vpack.c.bf16 %v1910_v43, %v1908_v42  ;;  %v1907_v45 = vld [vmem:[#allocation5 + $0x60] sm:$0xff]  ;;  %v2544_v6 = vpack.c.bf16 %v1921_v4, %v1919_v3  ;;  %v1944_v43 = vld [vmem:[#allocation5 + $0x188] sm:$0xff]  ;;  %v1950_v4 = vld [vmem:[#allocation5 + $0x1b8] sm:$0xff] }
  0xc9   :  { %2485 = vmatpush1.bf16.msra.mxu1 %v2484_v47  ;;  %2487 = vmatprep.subr.bf16.mxu0 %v2919_v48  ;;  %v2532_v47 = vpack.c.bf16 %v1909_v46, %v1907_v45  ;;  %v1923_v10 = vld [vmem:[#allocation5 + $0xe0] sm:$0xff]  ;;  %v1948_v3 = vld [vmem:[#allocation5 + $0x1a8] sm:$0xff] }
  0xca   :  { %2194 = vmatmul.mubr.msk.f32.gmra.mrb[16].mxu0 %vm2930_vm8, %v2714_v12  ;;  %2210 = vmatmul.mubr.msk.f32.gmra.mrb[16].mxu1 %vm2930_vm8, %v2714_v12 }
  0xcb   :  { %425 = vmatprep.mubr.f32.mxu0 %v2713_v5  ;;  %586 = vmatprep.mubr.f32.mxu1 %v2713_v5 }
  0xcc   :  { %2519 = vmatprep.subr.bf16.mxu1 %v2518_v31  ;;  %v1937_v31 = vld [vmem:[#allocation5 + $0x150] sm:$0xff] }
  0xcd   :  { %v2560_v49 = vpack.c.bf16 %v1937_v31, %v1935_v21 }
  0xce   :  { %2195 = vmatmul.mubr.msk.f32.gmra.mrb[18].mxu0 %vm2944_vm9, %v2714_v12  ;;  %2211 = vmatmul.mubr.msk.f32.gmra.mrb[18].mxu1 %vm2944_vm9, %v2714_v12 }
  0xcf   :  { %431 = vmatprep.mubr.f32.mxu0 %v2713_v5  ;;  %592 = vmatprep.mubr.f32.mxu1 %v2713_v5 }
  0xd2   :  { %2196 = vmatmul.mubr.msk.f32.gmra.mrb[20].mxu0 %vm2957_vm10, %v2714_v12  ;;  %2212 = vmatmul.mubr.msk.f32.gmra.mrb[20].mxu1 %vm2957_vm10, %v2714_v12 }
  0xd3   :  { %437 = vmatprep.mubr.f32.mxu0 %v2713_v5  ;;  %598 = vmatprep.mubr.f32.mxu1 %v2713_v5 }
  0xd6   :  { %2197 = vmatmul.mubr.msk.f32.gmra.mrb[22].mxu0 %vm2970_vm11, %v2714_v12  ;;  %2213 = vmatmul.mubr.msk.f32.gmra.mrb[22].mxu1 %vm2970_vm11, %v2714_v12 }
  0xd7   :  { %443 = vmatprep.mubr.f32.mxu0 %v2713_v5  ;;  %604 = vmatprep.mubr.f32.mxu1 %v2713_v5 }
  0xda   :  { %2198 = vmatmul.mubr.msk.f32.gmra.mrb[24].mxu0 %vm2983_vm12, %v2714_v12  ;;  %2214 = vmatmul.mubr.msk.f32.gmra.mrb[24].mxu1 %vm2983_vm12, %v2714_v12 }
  0xdb   :  { %449 = vmatprep.mubr.f32.mxu0 %v2713_v5  ;;  %610 = vmatprep.mubr.f32.mxu1 %v2713_v5 }
  0xde   :  { %2199 = vmatmul.mubr.msk.f32.gmra.mrb[26].mxu0 %vm2996_vm13, %v2714_v12  ;;  %2215 = vmatmul.mubr.msk.f32.gmra.mrb[26].mxu1 %vm2996_vm13, %v2714_v12 }
  0xdf   :  { %455 = vmatprep.mubr.f32.mxu0 %v2713_v5  ;;  %616 = vmatprep.mubr.f32.mxu1 %v2713_v5 }
  0xe2   :  { %2200 = vmatmul.mubr.msk.f32.gmra.mrb[28].mxu0 %vm3009_vm14, %v2714_v12  ;;  %2216 = vmatmul.mubr.msk.f32.gmra.mrb[28].mxu1 %vm3009_vm14, %v2714_v12 }
  0xe3   :  { %461 = vmatprep.mubr.f32.mxu0 %v2713_v5  ;;  %622 = vmatprep.mubr.f32.mxu1 %v2713_v5 }
  0xe6   :  { %2201 = vmatmul.mubr.msk.f32.gmra.mrb[30].mxu0 %vm3022_vm15, %v2714_v12  ;;  %2217 = vmatmul.mubr.msk.f32.gmra.mrb[30].mxu1 %vm3022_vm15, %v2714_v12 }
  0xe7   :  { %693 = vmatprep.mubr.f32.mxu0 %v2713_v5  ;;  %854 = vmatprep.mubr.f32.mxu1 %v2713_v5 }
  0xea   :  { %2218 = vmatmul.mubr.msk.f32.vlgmr.msra.gmra.mrb[32].mxu0 %vm2824_vm0, %v2714_v12  ;;  %2234 = vmatmul.mubr.msk.f32.vlgmr.msra.gmra.mrb[32].mxu1 %vm2824_vm0, %v2714_v12 }
  0xeb   :  { %2489 = vmatpush3.bf16.msra.mxu0 %v2919_v48  ;;  %699 = vmatprep.mubr.f32.mxu0 %v2713_v5  ;;  %v1912_v48 = vld [vmem:[#allocation5 + $0x88] sm:$0xff] }
  0xec   :  { %860 = vmatprep.mubr.f32.mxu1 %v2713_v5  ;;  %2491 = vmatprep.subr.bf16.mxu0 %v2490_v9  ;;  %v2534_v51 = vpack.c.bf16 %v1914_v50, %v1912_v48  ;;  %v1943_v50 = vld [vmem:[#allocation5 + $0x180] sm:$0xff] }
  0xed   :  { %2521 = vmatpush1.bf16.msra.mxu1 %v2520_v18 }
  0xee   :  { %2219 = vmatmul.mubr.msk.f32.gmra.mrb[34].mxu0 %vm2837_vm1, %v2714_v12  ;;  %2235 = vmatmul.mubr.msk.f32.gmra.mrb[34].mxu1 %vm2837_vm1, %v2714_v12 }
  0xef   :  { %705 = vmatprep.mubr.f32.mxu0 %v2713_v5  ;;  %866 = vmatprep.mubr.f32.mxu1 %v2713_v5 }
  0xf0   :  { %2493 = vmatpush3.bf16.msra.mxu0 %v2490_v9  ;;  %2523 = vmatprep.subr.bf16.mxu1 %v2522_v33  ;;  %v1926_v9 = vld [vmem:[#allocation5 + $0xf8] sm:$0xff]  ;;  %v1940_v33 = vld [vmem:[#allocation5 + $0x168] sm:$0xff] }
  0xf1   :  { %2495 = vmatprep.subr.bf16.mxu0 %v2494_v11  ;;  %2525 = vmatpush1.bf16.msra.mxu1 %v2524_v36  ;;  %v2546_v60 = vpack.c.bf16 %v1926_v9, %v1924_v8  ;;  %v2562_v35 = vpack.c.bf16 %v1942_v34, %v1940_v33  ;;  %v1939_v36 = vld [vmem:[#allocation5 + $0x160] sm:$0xff]  ;;  %v2570_v8 = vpack.c.bf16 %v1950_v4, %v1948_v3 }
  0xf2   :  { %2220 = vmatmul.mubr.msk.f32.gmra.mrb[36].mxu0 %vm2848_vm2, %v2714_v12  ;;  %2236 = vmatmul.mubr.msk.f32.gmra.mrb[36].mxu1 %vm2848_vm2, %v2714_v12  ;;  %v2564_v38 = vpack.c.bf16 %v1941_v37, %v1939_v36  ;;  %v1947_v9 = vld [vmem:[#allocation5 + $0x1a0] sm:$0xff] }
  0xf3   :  { %711 = vmatprep.mubr.f32.mxu0 %v2713_v5  ;;  %872 = vmatprep.mubr.f32.mxu1 %v2713_v5 }
  0xf4   :  { %2497 = vmatpush3.bf16.msra.mxu0 %v2494_v11  ;;  %2527 = vmatprep.subr.bf16.mxu1 %v2526_v39  ;;  %v1925_v11 = vld [vmem:[#allocation5 + $0xf0] sm:$0xff] }
  0xf5   :  { %2499 = vmatprep.subr.bf16.mxu0 %v2498_v15  ;;  %v2548_v13 = vpack.c.bf16 %v1925_v11, %v1923_v10 }
  0xf6   :  { %2221 = vmatmul.mubr.msk.f32.gmra.mrb[38].mxu0 %vm2863_vm3, %v2714_v12  ;;  %2237 = vmatmul.mubr.msk.f32.gmra.mrb[38].mxu1 %vm2863_vm3, %v2714_v12 }
  0xf7   :  { %717 = vmatprep.mubr.f32.mxu0 %v2713_v5  ;;  %878 = vmatprep.mubr.f32.mxu1 %v2713_v5 }
  0xf8   :  { %2501 = vmatpush3.bf16.msra.mxu0 %v2498_v15  ;;  %v1930_v15 = vld [vmem:[#allocation5 + $0x118] sm:$0xff] }
  0xf9   :  { %2503 = vmatprep.subr.bf16.mxu0 %v2502_v19  ;;  %v2550_v16 = vpack.c.bf16 %v1930_v15, %v1928_v14 }
  0xfa   :  { %2222 = vmatmul.mubr.msk.f32.gmra.mrb[40].mxu0 %vm2876_vm4, %v2714_v12  ;;  %2238 = vmatmul.mubr.msk.f32.gmra.mrb[40].mxu1 %vm2876_vm4, %v2714_v12 }
  0xfb   :  { %723 = vmatprep.mubr.f32.mxu0 %v2713_v5  ;;  %884 = vmatprep.mubr.f32.mxu1 %v2713_v5 }
  0xfc   :  { %2505 = vmatpush3.bf16.msra.mxu0 %v2502_v19  ;;  %v1929_v19 = vld [vmem:[#allocation5 + $0x110] sm:$0xff] }
  0xfd   :  { %2507 = vmatprep.subr.bf16.mxu0 %v2506_v23  ;;  %v2552_v20 = vpack.c.bf16 %v1929_v19, %v1927_v17 }
  0xfe   :  { %2223 = vmatmul.mubr.msk.f32.gmra.mrb[42].mxu0 %vm2889_vm5, %v2714_v12  ;;  %2239 = vmatmul.mubr.msk.f32.gmra.mrb[42].mxu1 %vm2889_vm5, %v2714_v12 }
  0xff   :  { %729 = vmatprep.mubr.f32.mxu0 %v2713_v5  ;;  %890 = vmatprep.mubr.f32.mxu1 %v2713_v5 }
 0x100   :  { %2509 = vmatpush3.bf16.msra.mxu0 %v2506_v23  ;;  %v1934_v23 = vld [vmem:[#allocation5 + $0x138] sm:$0xff] }
 0x101   :  { %2511 = vmatprep.subr.bf16.mxu0 %v2510_v26  ;;  %v2554_v24 = vpack.c.bf16 %v1934_v23, %v1932_v22  ;;  %v1952_v23 = vld [vmem:[#allocation5 + $0x1c8] sm:$0xff] }
 0x102   :  { %2224 = vmatmul.mubr.msk.f32.gmra.mrb[44].mxu0 %vm2902_vm6, %v2714_v12  ;;  %2240 = vmatmul.mubr.msk.f32.gmra.mrb[44].mxu1 %vm2902_vm6, %v2714_v12 }
 0x103   :  { %735 = vmatprep.mubr.f32.mxu0 %v2713_v5  ;;  %896 = vmatprep.mubr.f32.mxu1 %v2713_v5 }
 0x104   :  { %2513 = vmatpush3.bf16.msra.mxu0 %v2510_v26  ;;  %v1933_v26 = vld [vmem:[#allocation5 + $0x130] sm:$0xff] }
 0x105   :  { %2515 = vmatprep.subr.bf16.mxu0 %v2514_v29  ;;  %v2556_v27 = vpack.c.bf16 %v1933_v26, %v1931_v25 }
 0x106   :  { %2225 = vmatmul.mubr.msk.f32.gmra.mrb[46].mxu0 %vm2915_vm7, %v2714_v12  ;;  %2241 = vmatmul.mubr.msk.f32.gmra.mrb[46].mxu1 %vm2915_vm7, %v2714_v12 }
 0x107   :  { %741 = vmatprep.mubr.f32.mxu0 %v2713_v5  ;;  %902 = vmatprep.mubr.f32.mxu1 %v2713_v5 }
 0x108   :  { %2517 = vmatpush3.bf16.msra.mxu0 %v2514_v29  ;;  %v1938_v29 = vld [vmem:[#allocation5 + $0x158] sm:$0xff] }
 0x109   :  { %v2558_v7 = vpack.c.bf16 %v1938_v29, %v1936_v28  ;;  %v1951_v29 = vld [vmem:[#allocation5 + $0x1c0] sm:$0xff] }
 0x10a   :  { %2226 = vmatmul.mubr.msk.f32.gmra.mrb[48].mxu0 %vm2930_vm8, %v2714_v12  ;;  %2242 = vmatmul.mubr.msk.f32.gmra.mrb[48].mxu1 %vm2930_vm8, %v2714_v12 }
 0x10b   :  { %747 = vmatprep.mubr.f32.mxu0 %v2713_v5  ;;  %908 = vmatprep.mubr.f32.mxu1 %v2713_v5 }
 0x10e   :  { %2227 = vmatmul.mubr.msk.f32.gmra.mrb[50].mxu0 %vm2944_vm9, %v2714_v12  ;;  %2243 = vmatmul.mubr.msk.f32.gmra.mrb[50].mxu1 %vm2944_vm9, %v2714_v12 }
 0x10f   :  { %753 = vmatprep.mubr.f32.mxu0 %v2713_v5  ;;  %914 = vmatprep.mubr.f32.mxu1 %v2713_v5 }
 0x112   :  { %2228 = vmatmul.mubr.msk.f32.gmra.mrb[52].mxu0 %vm2957_vm10, %v2714_v12  ;;  %2244 = vmatmul.mubr.msk.f32.gmra.mrb[52].mxu1 %vm2957_vm10, %v2714_v12 }
 0x113   :  { %759 = vmatprep.mubr.f32.mxu0 %v2713_v5  ;;  %920 = vmatprep.mubr.f32.mxu1 %v2713_v5 }
 0x116   :  { %2229 = vmatmul.mubr.msk.f32.gmra.mrb[54].mxu0 %vm2970_vm11, %v2714_v12  ;;  %2245 = vmatmul.mubr.msk.f32.gmra.mrb[54].mxu1 %vm2970_vm11, %v2714_v12 }
 0x117   :  { %765 = vmatprep.mubr.f32.mxu0 %v2713_v5  ;;  %926 = vmatprep.mubr.f32.mxu1 %v2713_v5 }
 0x11a   :  { %2230 = vmatmul.mubr.msk.f32.gmra.mrb[56].mxu0 %vm2983_vm12, %v2714_v12  ;;  %2246 = vmatmul.mubr.msk.f32.gmra.mrb[56].mxu1 %vm2983_vm12, %v2714_v12 }
 0x11b   :  { %771 = vmatprep.mubr.f32.mxu0 %v2713_v5  ;;  %932 = vmatprep.mubr.f32.mxu1 %v2713_v5 }
 0x11e   :  { %2231 = vmatmul.mubr.msk.f32.gmra.mrb[58].mxu0 %vm2996_vm13, %v2714_v12  ;;  %2247 = vmatmul.mubr.msk.f32.gmra.mrb[58].mxu1 %vm2996_vm13, %v2714_v12 }
 0x11f   :  { %777 = vmatprep.mubr.f32.mxu0 %v2713_v5  ;;  %938 = vmatprep.mubr.f32.mxu1 %v2713_v5 }
 0x122   :  { %2232 = vmatmul.mubr.msk.f32.gmra.mrb[60].mxu0 %vm3009_vm14, %v2714_v12  ;;  %2248 = vmatmul.mubr.msk.f32.gmra.mrb[60].mxu1 %vm3009_vm14, %v2714_v12 }
 0x123   :  { %783 = vmatprep.mubr.f32.mxu0 %v2713_v5  ;;  %944 = vmatprep.mubr.f32.mxu1 %v2713_v5 }
 0x126   :  { %2233 = vmatmul.mubr.msk.f32.gmra.mrb[62].mxu0 %vm3022_vm15, %v2714_v12  ;;  %2249 = vmatmul.mubr.msk.f32.gmra.mrb[62].mxu1 %vm3022_vm15, %v2714_v12 }
 0x127   :  { %2334 = vmatprep.mubr.msk.f32.mxu0 %vm2824_vm0, %v2714_v12  ;;  %vm1112_vm0 = vcmask 1046528  }
 0x12a   :  { %2335 = vmatmul.mubr.msk.f32.vlgmr.msra.gmra.mrb[64].mxu0 %vm2837_vm1, %v2714_v12  ;;  %vm1848_vm1 = vcmask 1041409  }
 0x12b   :  { %2337 = vmatprep.mubr.msk.f32.mxu0 %vm2848_vm2, %v2714_v12  ;;  %vm1850_vm2 = vcmask 1042434  }
 0x12e   :  { %2338 = vmatmul.mubr.msk.f32.gmra.mrb[66].mxu0 %vm2863_vm3, %v2714_v12  ;;  %vm1852_vm3 = vcmask 1043459  }
 0x12f   :  { %2340 = vmatprep.mubr.msk.f32.mxu0 %vm2876_vm4, %v2714_v12  ;;  %vm1854_vm4 = vcmask 1044484  }
 0x132   :  { %2341 = vmatmul.mubr.msk.f32.gmra.mrb[68].mxu0 %vm2889_vm5, %v2714_v12  ;;  %vm1856_vm5 = vcmask 1045509  }
 0x133   :  { %2343 = vmatprep.mubr.msk.f32.mxu0 %vm2902_vm6, %v2714_v12  ;;  %vm1360_vm6 = vcmask 1045504  }
 0x136   :  { %2344 = vmatmul.mubr.msk.f32.gmra.mrb[70].mxu0 %vm2915_vm7, %v2714_v12  ;;  %vm1858_vm7 = vcmask 1046534  }
 0x137   :  { %2346 = vmatprep.mubr.msk.f32.mxu0 %vm2930_vm8, %v2714_v12  ;;  %vm1860_vm8 = vcmask 1047559  }
 0x13a   :  { %2347 = vmatmul.mubr.msk.f32.gmra.mrb[72].mxu0 %vm2944_vm9, %v2714_v12  ;;  %vm1680_vm9 = vcmask 1044480  }
 0x13b   :  { %2349 = vmatprep.mubr.msk.f32.mxu0 %vm2957_vm10, %v2714_v12 }
 0x13e   :  { %2350 = vmatmul.mubr.msk.f32.gmra.mrb[74].mxu0 %vm2970_vm11, %v2714_v12 }
 0x13f   :  { %2352 = vmatprep.mubr.msk.f32.mxu0 %vm2983_vm12, %v2714_v12 }
 0x142   :  { %2353 = vmatmul.mubr.msk.f32.gmra.mrb[76].mxu0 %vm2996_vm13, %v2714_v12 }
 0x143   :  { %2355 = vmatprep.mubr.msk.f32.mxu0 %vm3009_vm14, %v2714_v12 }
 0x146   :  { %2356 = vmatmul.mubr.msk.f32.gmra.mrb[78].mxu0 %vm3022_vm15, %v2714_v12  ;;  %v1903_v12 = vld [vmem:[#allocation5 + $0x40] sm:$0xff] }
 0x147   :  { %v2528_v41 = vpack.c.bf16 %v1905_v40, %v1903_v12 }
 0x149   :  { %2529 = vmatpush1.bf16.msra.mxu1 %v2528_v41 }
 0x14a   :  { %2531 = vmatprep.subr.bf16.mxu1 %v2530_v44  ;;  %v1946_v44 = vld [vmem:[#allocation5 + $0x198] sm:$0xff] }
 0x14b   :  { %v2566_v48 = vpack.c.bf16 %v1946_v44, %v1944_v43  ;;  %v1957_v43 = vld [vmem:[#allocation5 + $0x1f0] sm:$0xff] }
 0x14d   :  { %2533 = vmatpush1.bf16.msra.mxu1 %v2532_v47 }
 0x14e   :  { %2535 = vmatprep.subr.bf16.mxu1 %v2534_v51  ;;  %v1945_v51 = vld [vmem:[#allocation5 + $0x190] sm:$0xff] }
 0x14f   :  { %v2568_v53 = vpack.c.bf16 %v1945_v51, %v1943_v50 }
 0x151   :  { %2537 = vmatpush1.bf16.msra.mxu1 %v2536_v54 }
 0x152   :  { %2539 = vmatprep.subr.bf16.mxu1 %v2538_v58 }
 0x155   :  { %2541 = vmatpush1.bf16.msra.mxu1 %v2540_v62 }
 0x156   :  { %2543 = vmatprep.subr.bf16.mxu1 %v2542_v2 }
 0x159   :  { %2545 = vmatpush1.bf16.msra.mxu1 %v2544_v6 }
 0x15a   :  { %2547 = vmatprep.subr.bf16.mxu1 %v2546_v60  ;;  %v1949_v60 = vld [vmem:[#allocation5 + $0x1b0] sm:$0xff] }
 0x15b   :  { %v2572_v11 = vpack.c.bf16 %v1949_v60, %v1947_v9 }
 0x15d   :  { %2549 = vmatpush1.bf16.msra.mxu1 %v2548_v13 }
 0x15e   :  { %2551 = vmatprep.subr.bf16.mxu1 %v2550_v16 }
 0x161   :  { %2553 = vmatpush1.bf16.msra.mxu1 %v2552_v20 }
 0x162   :  { %2555 = vmatprep.subr.bf16.mxu1 %v2554_v24  ;;  %v1954_v24 = vld [vmem:[#allocation5 + $0x1d8] sm:$0xff] }
 0x163   :  { %v2574_v28 = vpack.c.bf16 %v1954_v24, %v1952_v23 }
 0x165   :  { %2557 = vmatpush1.bf16.msra.mxu1 %v2556_v27 }
 0x166   :  { %2559 = vmatprep.subr.bf16.mxu1 %v2558_v7  ;;  %v1953_v7 = vld [vmem:[#allocation5 + $0x1d0] sm:$0xff] }
 0x167   :  { %v2576_v31 = vpack.c.bf16 %v1953_v7, %v1951_v29 }
 0x169   :  { %2561 = vmatpush1.bf16.msra.mxu1 %v2560_v49 }
 0x16a   :  { %2563 = vmatprep.subr.bf16.mxu1 %v2562_v35 }
 0x16d   :  { %2565 = vmatpush1.bf16.msra.mxu1 %v2564_v38 }
 0x16e   :  { %2567 = vmatprep.subr.bf16.mxu1 %v2566_v48 }
 0x171   :  { %2569 = vmatpush1.bf16.msra.mxu1 %v2568_v53 }
 0x172   :  { %2571 = vmatprep.subr.bf16.mxu1 %v2570_v8 }
 0x175   :  { %2573 = vmatpush1.bf16.msra.mxu1 %v2572_v11 }
 0x176   :  { %2575 = vmatprep.subr.bf16.mxu1 %v2574_v28 }
 0x179   :  { %2577 = vmatpush1.bf16.msra.mxu1 %v2576_v31 }
 0x17d   :  { %v373_v1 = vpop.f32.mrb[0].mxu0  ;;  %v534_v18 = vpop.f32.mrb[0].mxu1 }
 0x17e   :  { %v375_v30 = vpop.f32.mrb[1].mxu0  ;;  %v536_v32 = vpop.f32.mrb[1].mxu1 }
 0x17f   :  { %v1113_v40 = vrot.slane %v375_v30, 1  ;;  %v1288_v45 = vrot.slane %v536_v32, 1 }
 0x181   :  { %v379_v39 = vpop.f32.mrb[2].mxu0  ;;  %v540_v12 = vpop.f32.mrb[2].mxu1 }
 0x182   :  { %v381_v41 = vpop.f32.mrb[3].mxu0  ;;  %v542_v42 = vpop.f32.mrb[3].mxu1 }
 0x183   :  { %v1114_v46 = vrot.slane %v381_v41, 1  ;;  %v1289_v47 = vrot.slane %v542_v42, 1  ;;  %v1955_v42 = vld [vmem:[#allocation5 + $0x1e0] sm:$0xff] }
 0x185   :  { %v1115_v54 = vsel %vm1112_vm0, %v1113_v40, %v1114_v46  ;;  %v1154_v55 = vadd.f32 %v1114_v46, %v379_v39  ;;  %v1290_v56 = vsel %vm1112_vm0, %v1288_v45, %v1289_v47  ;;  %v3216_v58 = vadd.f32 %v1289_v47, %v540_v12  ;;  %v385_v59 = vpop.f32.mrb[4].mxu0  ;;  %v546_v61 = vpop.f32.mrb[4].mxu1  ;;  %v1956_v39 = vld [vmem:[#allocation5 + $0x1e8] sm:$0xff]  ;;  %v1958_v12 = vld [vmem:[#allocation5 + $0x1f8] sm:$0xff] }
 0x186   :  { %v1153_v62 = vadd.f32 %v1115_v54, %v373_v1  ;;  %v3218_v63 = vadd.f32 %v1290_v56, %v534_v18  ;;  %v387_v0 = vpop.f32.mrb[5].mxu0  ;;  %v548_v2 = vpop.f32.mrb[5].mxu1  ;;  %v2578_v41 = vpack.c.bf16 %v1958_v12, %v1956_v39  ;;  %v2580_v46 = vpack.c.bf16 %v1957_v43, %v1955_v42 }
 0x187   :  { %v1177_v6 = vadd.f32 %v3212_v52, %v1154_v55  ;;  %v1116_v14 = vrot.slane %v387_v0, 1  ;;  %v1291_v19 = vrot.slane %v548_v2, 1 }
 0x188   :  { %v1176_v10 = vadd.f32 %v3212_v52, %v1153_v62  ;;  %2579 = vmatprep.subr.bf16.mxu1 %v2578_v41 }
 0x189   :  { %v1193_v13 = vmax.f32 %v1177_v6, 0.0  ;;  %v391_v15 = vpop.f32.mrb[6].mxu0  ;;  %v552_v16 = vpop.f32.mrb[6].mxu1  ;;  %2581 = vmatpush1.bf16.msra.mxu1 %v2580_v46 }
 0x18a   :  { %v1192_v17 = vmax.f32 %v1176_v10, 0.0  ;;  %v393_v20 = vpop.f32.mrb[7].mxu0  ;;  %v554_v22 = vpop.f32.mrb[7].mxu1 }
 0x18b   :  { %v1208_v25 = vsel %vm1112_vm0, %v1193_v13, -inf  ;;  %v1117_v26 = vrot.slane %v393_v20, 1  ;;  %v1292_v27 = vrot.slane %v554_v22, 1 }
 0x18c   :  { %v1209_v21 = vmax.f32 %v1192_v17, %v1208_v25  ;;  %v1962_v17 = vld [vmem:[#allocation5 + $0x218] sm:$0xff] }
 0x18d   :  { %v1118_v49 = vsel %vm1112_vm0, %v1116_v14, %v1117_v26  ;;  %v1156_v1 = vadd.f32 %v1117_v26, %v391_v15  ;;  %v1293_v18 = vsel %vm1112_vm0, %v1291_v19, %v1292_v27  ;;  %v3225_v30 = vadd.f32 %v1292_v27, %v552_v16  ;;  %v397_v32 = vpop.f32.mrb[8].mxu0  ;;  %v558_v33 = vpop.f32.mrb[8].mxu1  ;;  %v1960_v16 = vld [vmem:[#allocation5 + $0x208] sm:$0xff] }
 0x18e   :  { %v1210_v34 = vrot.slane %v1209_v21, 4  ;;  %v1155_v35 = vadd.f32 %v1118_v49, %v385_v59  ;;  %v3227_v36 = vadd.f32 %v1293_v18, %v546_v61  ;;  %v399_v37 = vpop.f32.mrb[9].mxu0  ;;  %v560_v38 = vpop.f32.mrb[9].mxu1  ;;  %v2582_v20 = vpack.c.bf16 %v1962_v17, %v1960_v16 }
 0x18f   :  { %v1179_v40 = vadd.f32 %v3212_v52, %v1156_v1  ;;  %v1119_v53 = vrot.slane %v399_v37, 1  ;;  %v1294_v59 = vrot.slane %v560_v38, 1 }
 0x190   :  { %v1211_v44 = vmax.f32 %v1209_v21, %v1210_v34  ;;  %v1178_v45 = vadd.f32 %v3212_v52, %v1155_v35  ;;  %2583 = vmatprep.subr.bf16.mxu1 %v2582_v20 }
 0x191   :  { %v1195_v47 = vmax.f32 %v1179_v40, 0.0  ;;  %v403_v48 = vpop.f32.mrb[10].mxu0  ;;  %v564_v50 = vpop.f32.mrb[10].mxu1 }
 0x192   :  { %v1194_v51 = vmax.f32 %v1178_v45, 0.0  ;;  %v405_v54 = vpop.f32.mrb[11].mxu0  ;;  %v566_v55 = vpop.f32.mrb[11].mxu1  ;;  %v1212_v0 = vrot.slane %v1211_v44, 2 }
 0x193   :  { %v1216_v56 = vsel %vm1112_vm0, %v1195_v47, -inf  ;;  %v1120_v61 = vrot.slane %v405_v54, 1  ;;  %v1295_v62 = vrot.slane %v566_v55, 1 }
 0x194   :  { %v1217_v2 = vmax.f32 %v1194_v51, %v1216_v56  ;;  %v1213_v22 = vmax.f32 %v1211_v44, %v1212_v0 }
 0x195   :  { %v1121_v3 = vsel %vm1112_vm0, %v1119_v53, %v1120_v61  ;;  %v1158_v4 = vadd.f32 %v1120_v61, %v403_v48  ;;  %v1296_v6 = vsel %vm1112_vm0, %v1294_v59, %v1295_v62  ;;  %v3234_v8 = vadd.f32 %v1295_v62, %v564_v50  ;;  %v409_v9 = vpop.f32.mrb[12].mxu0  ;;  %v570_v60 = vpop.f32.mrb[12].mxu1 }
 0x196   :  { %v1218_v10 = vrot.slane %v1217_v2, 4  ;;  %v1157_v11 = vadd.f32 %v1121_v3, %v397_v32  ;;  %v3236_v13 = vadd.f32 %v1296_v6, %v558_v33  ;;  %v411_v14 = vpop.f32.mrb[13].mxu0  ;;  %v572_v15 = vpop.f32.mrb[13].mxu1  ;;  %v1214_v33 = vrot.slane %v1213_v22, 1 }
 0x197   :  { %v1181_v19 = vadd.f32 %v3212_v52, %v1158_v4  ;;  %v1122_v7 = vrot.slane %v411_v14, 1  ;;  %v1297_v1 = vrot.slane %v572_v15, 1 }
 0x198   :  { %v1219_v23 = vmax.f32 %v1217_v2, %v1218_v10  ;;  %v1180_v24 = vadd.f32 %v3212_v52, %v1157_v11  ;;  %v1215_v50 = vmax.f32 %v1213_v22, %v1214_v33 }
 0x199   :  { %v1197_v25 = vmax.f32 %v1181_v19, 0.0  ;;  %v415_v26 = vpop.f32.mrb[14].mxu0  ;;  %v576_v27 = vpop.f32.mrb[14].mxu1 }
 0x19a   :  { %v1220_v28 = vrot.slane %v1219_v23, 2  ;;  %v1196_v29 = vmax.f32 %v1180_v24, 0.0  ;;  %v417_v21 = vpop.f32.mrb[15].mxu0  ;;  %v578_v31 = vpop.f32.mrb[15].mxu1 }
 0x19b   :  { %v1224_v49 = vsel %vm1112_vm0, %v1197_v25, -inf  ;;  %v1123_v18 = vrot.slane %v417_v21, 1  ;;  %v1298_v32 = vrot.slane %v578_v31, 1 }
 0x19c   :  { %v1221_v34 = vmax.f32 %v1219_v23, %v1220_v28  ;;  %v1225_v35 = vmax.f32 %v1196_v29, %v1224_v49 }
 0x19d   :  { %v1124_v37 = vsel %vm1112_vm0, %v1122_v7, %v1123_v18  ;;  %v1160_v38 = vadd.f32 %v1123_v18, %v415_v26  ;;  %v1299_v39 = vsel %vm1112_vm0, %v1297_v1, %v1298_v32  ;;  %v3243_v12 = vadd.f32 %v1298_v32, %v576_v27  ;;  %v421_v40 = vpop.f32.mrb[16].mxu0  ;;  %v582_v41 = vpop.f32.mrb[16].mxu1 }
 0x19e   :  { %v1222_v42 = vrot.slane %v1221_v34, 1  ;;  %v1226_v43 = vrot.slane %v1225_v35, 4  ;;  %v1159_v44 = vadd.f32 %v1124_v37, %v409_v9  ;;  %v3245_v45 = vadd.f32 %v1299_v39, %v570_v60  ;;  %v423_v46 = vpop.f32.mrb[17].mxu0  ;;  %v584_v47 = vpop.f32.mrb[17].mxu1 }
 0x19f   :  { %v1183_v48 = vadd.f32 %v3212_v52, %v1160_v38  ;;  %v1125_v0 = vrot.slane %v423_v46, 1  ;;  %v1300_v9 = vrot.slane %v584_v47, 1 }
 0x1a0   :  { %v1223_v51 = vmax.f32 %v1221_v34, %v1222_v42  ;;  %v1227_v53 = vmax.f32 %v1225_v35, %v1226_v43  ;;  %v1182_v54 = vadd.f32 %v3212_v52, %v1159_v44 }
 0x1a1   :  { %v1199_v55 = vmax.f32 %v1183_v48, 0.0  ;;  %v427_v56 = vpop.f32.mrb[18].mxu0  ;;  %v588_v59 = vpop.f32.mrb[18].mxu1 }
 0x1a2   :  { %v1228_v61 = vrot.slane %v1227_v53, 2  ;;  %v1198_v62 = vmax.f32 %v1182_v54, 0.0  ;;  %v429_v2 = vpop.f32.mrb[19].mxu0  ;;  %v590_v3 = vpop.f32.mrb[19].mxu1  ;;  %v1849_v4 = vsel %vm1848_vm1, %v1223_v51, %v1215_v50 }
 0x1a3   :  { %v1232_v6 = vsel %vm1112_vm0, %v1199_v55, -inf  ;;  %v1126_v60 = vrot.slane %v429_v2, 1  ;;  %v1301_v10 = vrot.slane %v590_v3, 1 }
 0x1a4   :  { %v1229_v11 = vmax.f32 %v1227_v53, %v1228_v61  ;;  %v1233_v14 = vmax.f32 %v1198_v62, %v1232_v6 }
 0x1a5   :  { %v1127_v15 = vsel %vm1112_vm0, %v1125_v0, %v1126_v60  ;;  %v1162_v16 = vadd.f32 %v1126_v60, %v427_v56  ;;  %v1302_v17 = vsel %vm1112_vm0, %v1300_v9, %v1301_v10  ;;  %v3253_v19 = vadd.f32 %v1301_v10, %v588_v59  ;;  %v433_v20 = vpop.f32.mrb[20].mxu0  ;;  %v594_v22 = vpop.f32.mrb[20].mxu1 }
 0x1a6   :  { %v1230_v23 = vrot.slane %v1229_v11, 1  ;;  %v1234_v24 = vrot.slane %v1233_v14, 4  ;;  %v1161_v25 = vadd.f32 %v1127_v15, %v421_v40  ;;  %v3255_v26 = vadd.f32 %v1302_v17, %v582_v41  ;;  %v435_v27 = vpop.f32.mrb[21].mxu0  ;;  %v596_v28 = vpop.f32.mrb[21].mxu1 }
 0x1a7   :  { %v1185_v29 = vadd.f32 %v3212_v52, %v1162_v16  ;;  %v1128_v34 = vrot.slane %v435_v27, 1  ;;  %v1303_v40 = vrot.slane %v596_v28, 1 }
 0x1a8   :  { %v1231_v7 = vmax.f32 %v1229_v11, %v1230_v23  ;;  %v1235_v21 = vmax.f32 %v1233_v14, %v1234_v24  ;;  %v1184_v31 = vadd.f32 %v3212_v52, %v1161_v25 }
 0x1a9   :  { %v1201_v49 = vmax.f32 %v1185_v29, 0.0  ;;  %v439_v1 = vpop.f32.mrb[22].mxu0  ;;  %v600_v18 = vpop.f32.mrb[22].mxu1 }
 0x1aa   :  { %v1236_v32 = vrot.slane %v1235_v21, 2  ;;  %v1200_v33 = vmax.f32 %v1184_v31, 0.0  ;;  %v441_v35 = vpop.f32.mrb[23].mxu0  ;;  %v602_v37 = vpop.f32.mrb[23].mxu1  ;;  %v1851_v38 = vsel %vm1850_vm2, %v1231_v7, %v1849_v4 }
 0x1ab   :  { %v1240_v39 = vsel %vm1112_vm0, %v1201_v49, -inf  ;;  %v1129_v41 = vrot.slane %v441_v35, 1  ;;  %v1304_v42 = vrot.slane %v602_v37, 1 }
 0x1ac   :  { %v1237_v43 = vmax.f32 %v1235_v21, %v1236_v32  ;;  %v1241_v44 = vmax.f32 %v1200_v33, %v1240_v39 }
 0x1ad   :  { %v1130_v46 = vsel %vm1112_vm0, %v1128_v34, %v1129_v41  ;;  %v1164_v47 = vadd.f32 %v1129_v41, %v439_v1  ;;  %v1305_v48 = vsel %vm1112_vm0, %v1303_v40, %v1304_v42  ;;  %v3263_v50 = vadd.f32 %v1304_v42, %v600_v18  ;;  %v445_v51 = vpop.f32.mrb[24].mxu0  ;;  %v606_v53 = vpop.f32.mrb[24].mxu1 }
 0x1ae   :  { %v1238_v54 = vrot.slane %v1237_v43, 1  ;;  %v1242_v55 = vrot.slane %v1241_v44, 4  ;;  %v1163_v56 = vadd.f32 %v1130_v46, %v433_v20  ;;  %v3265_v59 = vadd.f32 %v1305_v48, %v594_v22  ;;  %v447_v61 = vpop.f32.mrb[25].mxu0  ;;  %v608_v62 = vpop.f32.mrb[25].mxu1 }
 0x1af   :  { %v1187_v0 = vadd.f32 %v3212_v52, %v1164_v47  ;;  %v1131_v14 = vrot.slane %v447_v61, 1  ;;  %v1306_v22 = vrot.slane %v608_v62, 1 }
 0x1b0   :  { %v1239_v2 = vmax.f32 %v1237_v43, %v1238_v54  ;;  %v1243_v3 = vmax.f32 %v1241_v44, %v1242_v55  ;;  %v1186_v4 = vadd.f32 %v3212_v52, %v1163_v56 }
 0x1b1   :  { %v1203_v6 = vmax.f32 %v1187_v0, 0.0  ;;  %v451_v9 = vpop.f32.mrb[26].mxu0  ;;  %v612_v60 = vpop.f32.mrb[26].mxu1 }
 0x1b2   :  { %v1244_v10 = vrot.slane %v1243_v3, 2  ;;  %v1202_v11 = vmax.f32 %v1186_v4, 0.0  ;;  %v453_v15 = vpop.f32.mrb[27].mxu0  ;;  %v614_v16 = vpop.f32.mrb[27].mxu1  ;;  %v1853_v17 = vsel %vm1852_vm3, %v1239_v2, %v1851_v38 }
 0x1b3   :  { %v1248_v20 = vsel %vm1112_vm0, %v1203_v6, -inf  ;;  %v1132_v23 = vrot.slane %v453_v15, 1  ;;  %v1307_v24 = vrot.slane %v614_v16, 1 }
 0x1b4   :  { %v1245_v25 = vmax.f32 %v1243_v3, %v1244_v10  ;;  %v1249_v27 = vmax.f32 %v1202_v11, %v1248_v20 }
 0x1b5   :  { %v1133_v28 = vsel %vm1112_vm0, %v1131_v14, %v1132_v23  ;;  %v1166_v29 = vadd.f32 %v1132_v23, %v451_v9  ;;  %v1308_v7 = vsel %vm1112_vm0, %v1306_v22, %v1307_v24  ;;  %v3273_v21 = vadd.f32 %v1307_v24, %v612_v60  ;;  %v457_v31 = vpop.f32.mrb[28].mxu0  ;;  %v618_v49 = vpop.f32.mrb[28].mxu1 }
 0x1b6   :  { %v1246_v1 = vrot.slane %v1245_v25, 1  ;;  %v1250_v18 = vrot.slane %v1249_v27, 4  ;;  %v1165_v32 = vadd.f32 %v1133_v28, %v445_v51  ;;  %v3275_v33 = vadd.f32 %v1308_v7, %v606_v53  ;;  %v459_v34 = vpop.f32.mrb[29].mxu0  ;;  %v620_v35 = vpop.f32.mrb[29].mxu1 }
 0x1b7   :  { %v1189_v37 = vadd.f32 %v3212_v52, %v1166_v29  ;;  %v1134_v47 = vrot.slane %v459_v34, 1  ;;  %v1309_v55 = vrot.slane %v620_v35, 1 }
 0x1b8   :  { %v1247_v38 = vmax.f32 %v1245_v25, %v1246_v1  ;;  %v1251_v39 = vmax.f32 %v1249_v27, %v1250_v18  ;;  %v1188_v40 = vadd.f32 %v3212_v52, %v1165_v32 }
 0x1b9   :  { %v1205_v41 = vmax.f32 %v1189_v37, 0.0  ;;  %v463_v42 = vpop.f32.mrb[30].mxu0  ;;  %v624_v43 = vpop.f32.mrb[30].mxu1 }
 0x1ba   :  { %v1252_v44 = vrot.slane %v1251_v39, 2  ;;  %v1204_v46 = vmax.f32 %v1188_v40, 0.0  ;;  %v465_v48 = vpop.f32.mrb[31].mxu0  ;;  %v626_v54 = vpop.f32.mrb[31].mxu1  ;;  %v1855_v51 = vsel %vm1854_vm4, %v1247_v38, %v1853_v17 }
 0x1bb   :  { %v1256_v53 = vsel %vm1112_vm0, %v1205_v41, -inf  ;;  %v1135_v56 = vrot.slane %v465_v48, 1  ;;  %v1310_v61 = vrot.slane %v626_v54, 1 }
 0x1bc   :  { %v1253_v62 = vmax.f32 %v1251_v39, %v1252_v44  ;;  %v1257_v0 = vmax.f32 %v1204_v46, %v1256_v53 }
 0x1bd   :  { %v1136_v2 = vsel %vm1112_vm0, %v1134_v47, %v1135_v56  ;;  %v1168_v3 = vadd.f32 %v1135_v56, %v463_v42  ;;  %v1311_v4 = vsel %vm1112_vm0, %v1309_v55, %v1310_v61  ;;  %v3283_v6 = vadd.f32 %v1310_v61, %v624_v43  ;;  %v695_v9 = vpop.f32.mrb[32].mxu0  ;;  %v856_v60 = vpop.f32.mrb[32].mxu1 }
 0x1be   :  { %v1254_v10 = vrot.slane %v1253_v62, 1  ;;  %v1258_v11 = vrot.slane %v1257_v0, 4  ;;  %v1167_v14 = vadd.f32 %v1136_v2, %v457_v31  ;;  %v3285_v15 = vadd.f32 %v1311_v4, %v618_v49  ;;  %v697_v16 = vpop.f32.mrb[33].mxu0  ;;  %v858_v17 = vpop.f32.mrb[33].mxu1 }
 0x1bf   :  { %v1191_v20 = vadd.f32 %v3212_v52, %v1168_v3  ;;  %v1361_v27 = vrot.slane %v695_v9, 2  ;;  %v1536_v28 = vrot.slane %v856_v60, 1  ;;  %v1608_v37 = vrot.slane %v858_v17, 2 }
 0x1c0   :  { %v1255_v22 = vmax.f32 %v1253_v62, %v1254_v10  ;;  %v1259_v23 = vmax.f32 %v1257_v0, %v1258_v11  ;;  %v1190_v24 = vadd.f32 %v3212_v52, %v1167_v14  ;;  %v3293_v52 = vld [vmem:[%s3555_s2 + $0x1] ss:$0 sm:$0xff] }
 0x1c1   :  { %v1207_v25 = vmax.f32 %v1191_v20, 0.0  ;;  %v701_v29 = vpop.f32.mrb[34].mxu0  ;;  %v862_v7 = vpop.f32.mrb[34].mxu1 }
 0x1c2   :  { %v1260_v1 = vrot.slane %v1259_v23, 2  ;;  %v1206_v18 = vmax.f32 %v1190_v24, 0.0  ;;  %v1362_v31 = vrot.slane %v701_v29, 2  ;;  %v1537_v49 = vrot.slane %v862_v7, 1  ;;  %v703_v32 = vpop.f32.mrb[35].mxu0  ;;  %v864_v34 = vpop.f32.mrb[35].mxu1 }
 0x1c3   :  { %v1264_v35 = vsel %vm1112_vm0, %v1207_v25, -inf  ;;  %v1609_v38 = vrot.slane %v864_v34, 2  ;;  %v1857_v39 = vsel %vm1856_vm5, %v1255_v22, %v1855_v51 }
 0x1c4   :  { %v1261_v40 = vmax.f32 %v1259_v23, %v1260_v1  ;;  %v1265_v41 = vmax.f32 %v1206_v18, %v1264_v35  ;;  %v1363_v42 = vsel %vm1360_vm6, %v1361_v27, %v1362_v31  ;;  %v1402_v43 = vadd.f32 %v1362_v31, %v3216_v58 }
 0x1c5   :  { %v1401_v44 = vadd.f32 %v1363_v42, %v3218_v63  ;;  %v1538_v46 = vsel %vm1112_vm0, %v1536_v28, %v1537_v49  ;;  %v1577_v47 = vadd.f32 %v1537_v49, %v703_v32  ;;  %v1610_v48 = vsel %vm1360_vm6, %v1608_v37, %v1609_v38  ;;  %v707_v54 = vpop.f32.mrb[36].mxu0  ;;  %v868_v53 = vpop.f32.mrb[36].mxu1 }
 0x1c6   :  { %v1262_v55 = vrot.slane %v1261_v40, 1  ;;  %v1266_v56 = vrot.slane %v1265_v41, 4  ;;  %v1425_v61 = vadd.f32 %v3293_v52, %v1402_v43  ;;  %v1576_v51 = vadd.f32 %v1538_v46, %v697_v16  ;;  %v709_v62 = vpop.f32.mrb[37].mxu0  ;;  %v870_v0 = vpop.f32.mrb[37].mxu1 }
 0x1c7   :  { %v1424_v2 = vadd.f32 %v3293_v52, %v1401_v44  ;;  %v3303_v3 = vadd.f32 %v1609_v38, %v1577_v47  ;;  %v1364_v60 = vrot.slane %v707_v54, 2  ;;  %v1539_v10 = vrot.slane %v868_v53, 1 }
 0x1c8   :  { %v1267_v58 = vmax.f32 %v1265_v41, %v1266_v56  ;;  %v1441_v63 = vmax.f32 %v1425_v61, 0.0  ;;  %v3305_v4 = vadd.f32 %v1610_v48, %v1576_v51  ;;  %v1263_v17 = vmax.f32 %v1261_v40, %v1262_v55 }
 0x1c9   :  { %v1440_v9 = vmax.f32 %v1424_v2, 0.0  ;;  %v713_v11 = vpop.f32.mrb[38].mxu0  ;;  %v874_v14 = vpop.f32.mrb[38].mxu1  ;;  %v1611_v28 = vrot.slane %v870_v0, 2 }
 0x1ca   :  { %v1268_v20 = vrot.slane %v1267_v58, 2  ;;  %v1456_v16 = vsel %vm1360_vm6, %v1441_v63, -inf  ;;  %v1365_v22 = vrot.slane %v713_v11, 2  ;;  %v1540_v23 = vrot.slane %v874_v14, 1  ;;  %v715_v24 = vpop.f32.mrb[39].mxu0  ;;  %v876_v25 = vpop.f32.mrb[39].mxu1 }
 0x1cb   :  { %v1457_v27 = vmax.f32 %v1440_v9, %v1456_v16  ;;  %v1612_v29 = vrot.slane %v876_v25, 2  ;;  %v1859_v7 = vsel %vm1858_vm7, %v1263_v17, %v1857_v39 }
 0x1cc   :  { %v1269_v1 = vmax.f32 %v1267_v58, %v1268_v20  ;;  %v1366_v18 = vsel %vm1360_vm6, %v1364_v60, %v1365_v22  ;;  %v1404_v31 = vadd.f32 %v1365_v22, %v3225_v30  ;;  %v1541_v49 = vsel %vm1112_vm0, %v1539_v10, %v1540_v23 }
 0x1cd   :  { %v1458_v32 = vrot.slane %v1457_v27, 4  ;;  %v1403_v34 = vadd.f32 %v1366_v18, %v3227_v36  ;;  %v1578_v35 = vadd.f32 %v1541_v49, %v709_v62  ;;  %v1579_v37 = vadd.f32 %v1540_v23, %v715_v24  ;;  %v719_v38 = vpop.f32.mrb[40].mxu0  ;;  %v880_v40 = vpop.f32.mrb[40].mxu1 }
 0x1ce   :  { %v1427_v41 = vadd.f32 %v3293_v52, %v1404_v31  ;;  %v1613_v42 = vsel %vm1360_vm6, %v1611_v28, %v1612_v29  ;;  %v721_v43 = vpop.f32.mrb[41].mxu0  ;;  %v882_v39 = vpop.f32.mrb[41].mxu1  ;;  %v1270_v54 = vrot.slane %v1269_v1, 1  ;;  %v1367_v55 = vrot.slane %v719_v38, 2 }
 0x1cf   :  { %v1459_v44 = vmax.f32 %v1457_v27, %v1458_v32  ;;  %v1426_v46 = vadd.f32 %v3293_v52, %v1403_v34  ;;  %v3316_v47 = vadd.f32 %v1613_v42, %v1578_v35  ;;  %v3318_v30 = vadd.f32 %v1612_v29, %v1579_v37 }
 0x1d0   :  { %v1443_v48 = vmax.f32 %v1427_v41, 0.0  ;;  %v1542_v62 = vrot.slane %v880_v40, 1  ;;  %v1614_v60 = vrot.slane %v882_v39, 2  ;;  %v1271_v11 = vmax.f32 %v1269_v1, %v1270_v54 }
 0x1d1   :  { %v1460_v36 = vrot.slane %v1459_v44, 2  ;;  %v1442_v53 = vmax.f32 %v1426_v46, 0.0  ;;  %v725_v56 = vpop.f32.mrb[42].mxu0  ;;  %v886_v61 = vpop.f32.mrb[42].mxu1 }
 0x1d2   :  { %v1464_v51 = vsel %vm1360_vm6, %v1443_v48, -inf  ;;  %v1368_v0 = vrot.slane %v725_v56, 2  ;;  %v1543_v2 = vrot.slane %v886_v61, 1  ;;  %v727_v58 = vpop.f32.mrb[43].mxu0  ;;  %v888_v63 = vpop.f32.mrb[43].mxu1  ;;  %v3333_v37 = vsel %vm1860_vm8, %v1271_v11, %v1859_v7 }
 0x1d3   :  { %v1465_v9 = vmax.f32 %v1442_v53, %v1464_v51  ;;  %v1615_v10 = vrot.slane %v888_v63, 2  ;;  %v1461_v22 = vmax.f32 %v1459_v44, %v1460_v36 }
 0x1d4   :  { %v1369_v14 = vsel %vm1360_vm6, %v1367_v55, %v1368_v0  ;;  %v1406_v17 = vadd.f32 %v1368_v0, %v3234_v8  ;;  %v1544_v20 = vsel %vm1112_vm0, %v1542_v62, %v1543_v2  ;;  %v1581_v16 = vadd.f32 %v1543_v2, %v727_v58 }
 0x1d5   :  { %v1466_v23 = vrot.slane %v1465_v9, 4  ;;  %v1405_v24 = vadd.f32 %v1369_v14, %v3236_v13  ;;  %v1580_v25 = vadd.f32 %v1544_v20, %v721_v43  ;;  %v731_v27 = vpop.f32.mrb[44].mxu0  ;;  %v892_v28 = vpop.f32.mrb[44].mxu1  ;;  %v1616_v18 = vsel %vm1360_vm6, %v1614_v60, %v1615_v10 }
 0x1d6   :  { %v1429_v29 = vadd.f32 %v3293_v52, %v1406_v17  ;;  %v3327_v31 = vadd.f32 %v1615_v10, %v1581_v16  ;;  %v733_v1 = vpop.f32.mrb[45].mxu0  ;;  %v894_v49 = vpop.f32.mrb[45].mxu1  ;;  %v1462_v13 = vrot.slane %v1461_v22, 1  ;;  %v1370_v41 = vrot.slane %v731_v27, 2 }
 0x1d7   :  { %v1467_v32 = vmax.f32 %v1465_v9, %v1466_v23  ;;  %v1428_v8 = vadd.f32 %v3293_v52, %v1405_v24  ;;  %v3330_v34 = vadd.f32 %v1616_v18, %v1580_v25  ;;  %v1545_v44 = vrot.slane %v892_v28, 1 }
 0x1d8   :  { %v1445_v35 = vmax.f32 %v1429_v29, 0.0  ;;  %v1617_v56 = vrot.slane %v894_v49, 2  ;;  %v1463_v11 = vmax.f32 %v1461_v22, %v1462_v13 }
 0x1d9   :  { %v1468_v38 = vrot.slane %v1467_v32, 2  ;;  %v1444_v40 = vmax.f32 %v1428_v8, 0.0  ;;  %v737_v42 = vpop.f32.mrb[46].mxu0  ;;  %v898_v43 = vpop.f32.mrb[46].mxu1 }
 0x1da   :  { %v1472_v39 = vsel %vm1360_vm6, %v1445_v35, -inf  ;;  %v1371_v46 = vrot.slane %v737_v42, 2  ;;  %v1546_v48 = vrot.slane %v898_v43, 1  ;;  %v739_v54 = vpop.f32.mrb[47].mxu0  ;;  %v900_v36 = vpop.f32.mrb[47].mxu1 }
 0x1db   :  { %v1469_v53 = vmax.f32 %v1467_v32, %v1468_v38  ;;  %v1473_v55 = vmax.f32 %v1444_v40, %v1472_v39  ;;  %v1618_v61 = vrot.slane %v900_v36, 2 }
 0x1dc   :  { %v1372_v7 = vsel %vm1360_vm6, %v1370_v41, %v1371_v46  ;;  %v1408_v51 = vadd.f32 %v1371_v46, %v3243_v12  ;;  %v1547_v62 = vsel %vm1112_vm0, %v1545_v44, %v1546_v48  ;;  %v1583_v0 = vadd.f32 %v1546_v48, %v739_v54 }
 0x1dd   :  { %v1470_v2 = vrot.slane %v1469_v53, 1  ;;  %v1474_v58 = vrot.slane %v1473_v55, 4  ;;  %v1407_v63 = vadd.f32 %v1372_v7, %v3245_v45  ;;  %v1582_v9 = vadd.f32 %v1547_v62, %v733_v1  ;;  %v743_v60 = vpop.f32.mrb[48].mxu0  ;;  %v904_v10 = vpop.f32.mrb[48].mxu1 }
 0x1de   :  { %v1431_v14 = vadd.f32 %v3293_v52, %v1408_v51  ;;  %v1619_v17 = vsel %vm1360_vm6, %v1617_v56, %v1618_v61  ;;  %v3342_v20 = vadd.f32 %v1618_v61, %v1583_v0  ;;  %v745_v16 = vpop.f32.mrb[49].mxu0  ;;  %v906_v23 = vpop.f32.mrb[49].mxu1  ;;  %v1373_v18 = vrot.slane %v743_v60, 2 }
 0x1df   :  { %v1471_v12 = vmax.f32 %v1469_v53, %v1470_v2  ;;  %v1475_v24 = vmax.f32 %v1473_v55, %v1474_v58  ;;  %v1430_v25 = vadd.f32 %v3293_v52, %v1407_v63  ;;  %v3345_v27 = vadd.f32 %v1619_v17, %v1582_v9 }
 0x1e0   :  { %v1447_v28 = vmax.f32 %v1431_v14, 0.0  ;;  %v1548_v8 = vrot.slane %v904_v10, 1  ;;  %v1620_v43 = vrot.slane %v906_v23, 2 }
 0x1e1   :  { %v1476_v45 = vrot.slane %v1475_v24, 2  ;;  %v1446_v29 = vmax.f32 %v1430_v25, 0.0  ;;  %v749_v1 = vpop.f32.mrb[50].mxu0  ;;  %v910_v22 = vpop.f32.mrb[50].mxu1  ;;  %v1871_v49 = vsel %vm1848_vm1, %v1471_v12, %v1463_v11 }
 0x1e2   :  { %v1480_v32 = vsel %vm1360_vm6, %v1447_v28, -inf  ;;  %v1374_v35 = vrot.slane %v749_v1, 2  ;;  %v1549_v13 = vrot.slane %v910_v22, 1  ;;  %v751_v38 = vpop.f32.mrb[51].mxu0  ;;  %v912_v40 = vpop.f32.mrb[51].mxu1 }
 0x1e3   :  { %v1477_v41 = vmax.f32 %v1475_v24, %v1476_v45  ;;  %v1481_v42 = vmax.f32 %v1446_v29, %v1480_v32  ;;  %v1621_v39 = vrot.slane %v912_v40, 2 }
 0x1e4   :  { %v1375_v44 = vsel %vm1360_vm6, %v1373_v18, %v1374_v35  ;;  %v1410_v46 = vadd.f32 %v1374_v35, %v3253_v19  ;;  %v1550_v48 = vsel %vm1112_vm0, %v1548_v8, %v1549_v13  ;;  %v1585_v54 = vadd.f32 %v1549_v13, %v751_v38 }
 0x1e5   :  { %v1478_v36 = vrot.slane %v1477_v41, 1  ;;  %v1482_v53 = vrot.slane %v1481_v42, 4  ;;  %v1409_v55 = vadd.f32 %v1375_v44, %v3255_v26  ;;  %v1584_v56 = vadd.f32 %v1550_v48, %v745_v16  ;;  %v755_v61 = vpop.f32.mrb[52].mxu0  ;;  %v916_v7 = vpop.f32.mrb[52].mxu1 }
 0x1e6   :  { %v1433_v51 = vadd.f32 %v3293_v52, %v1410_v46  ;;  %v1622_v62 = vsel %vm1360_vm6, %v1620_v43, %v1621_v39  ;;  %v3355_v0 = vadd.f32 %v1621_v39, %v1585_v54  ;;  %v757_v2 = vpop.f32.mrb[53].mxu0  ;;  %v918_v58 = vpop.f32.mrb[53].mxu1  ;;  %v1376_v14 = vrot.slane %v755_v61, 2 }
 0x1e7   :  { %v1479_v63 = vmax.f32 %v1477_v41, %v1478_v36  ;;  %v1483_v19 = vmax.f32 %v1481_v42, %v1482_v53  ;;  %v1432_v9 = vadd.f32 %v3293_v52, %v1409_v55  ;;  %v3358_v60 = vadd.f32 %v1622_v62, %v1584_v56 }
 0x1e8   :  { %v1449_v10 = vmax.f32 %v1433_v51, 0.0  ;;  %v1551_v24 = vrot.slane %v916_v7, 1  ;;  %v1623_v22 = vrot.slane %v918_v58, 2 }
 0x1e9   :  { %v1484_v11 = vrot.slane %v1483_v19, 2  ;;  %v1448_v26 = vmax.f32 %v1432_v9, 0.0  ;;  %v761_v17 = vpop.f32.mrb[54].mxu0  ;;  %v922_v16 = vpop.f32.mrb[54].mxu1  ;;  %v1872_v23 = vsel %vm1850_vm2, %v1479_v63, %v1871_v49 }
 0x1ea   :  { %v1488_v12 = vsel %vm1360_vm6, %v1449_v10, -inf  ;;  %v1377_v25 = vrot.slane %v761_v17, 2  ;;  %v1552_v28 = vrot.slane %v922_v16, 1  ;;  %v763_v45 = vpop.f32.mrb[55].mxu0  ;;  %v924_v29 = vpop.f32.mrb[55].mxu1 }
 0x1eb   :  { %v1485_v18 = vmax.f32 %v1483_v19, %v1484_v11  ;;  %v1489_v1 = vmax.f32 %v1448_v26, %v1488_v12  ;;  %v1624_v32 = vrot.slane %v924_v29, 2  ;;  %v3378_v29 = vld [vmem:[#allocation5 + $0x200] sm:$0xff] }
 0x1ec   :  { %v1378_v8 = vsel %vm1360_vm6, %v1376_v14, %v1377_v25  ;;  %v1412_v35 = vadd.f32 %v1377_v25, %v3263_v50  ;;  %v1553_v13 = vsel %vm1112_vm0, %v1551_v24, %v1552_v28  ;;  %v1587_v38 = vadd.f32 %v1552_v28, %v763_v45 }
 0x1ed   :  { %v1486_v40 = vrot.slane %v1485_v18, 1  ;;  %v1490_v49 = vrot.slane %v1489_v1, 4  ;;  %v1411_v41 = vadd.f32 %v1378_v8, %v3265_v59  ;;  %v1586_v42 = vadd.f32 %v1553_v13, %v757_v2  ;;  %v767_v43 = vpop.f32.mrb[56].mxu0  ;;  %v928_v39 = vpop.f32.mrb[56].mxu1  ;;  %v3383_v13 = vld [vmem:[#allocation5 + $0x228] sm:$0xff] }
 0x1ee   :  { %v1435_v44 = vadd.f32 %v3293_v52, %v1412_v35  ;;  %v1625_v46 = vsel %vm1360_vm6, %v1623_v22, %v1624_v32  ;;  %v3368_v48 = vadd.f32 %v1624_v32, %v1587_v38  ;;  %v769_v54 = vpop.f32.mrb[57].mxu0  ;;  %v930_v36 = vpop.f32.mrb[57].mxu1  ;;  %v1379_v51 = vrot.slane %v767_v43, 2  ;;  %v3385_v38 = vld [vmem:[#allocation5 + $0x238] sm:$0xff] }
 0x1ef   :  { %v1487_v53 = vmax.f32 %v1485_v18, %v1486_v40  ;;  %v1491_v50 = vmax.f32 %v1489_v1, %v1490_v49  ;;  %v1434_v55 = vadd.f32 %v3293_v52, %v1411_v41  ;;  %v3371_v56 = vadd.f32 %v1625_v46, %v1586_v42 }
 0x1f0   :  { %v1451_v61 = vmax.f32 %v1435_v44, 0.0  ;;  %v1554_v19 = vrot.slane %v928_v39, 1  ;;  %v1626_v16 = vrot.slane %v930_v36, 2  ;;  %v2586_v36 = vpack.c.bf16 %v3385_v38, %v3383_v13 }
 0x1f1   :  { %v1492_v7 = vrot.slane %v1491_v50, 2  ;;  %v1450_v59 = vmax.f32 %v1434_v55, 0.0  ;;  %v773_v62 = vpop.f32.mrb[58].mxu0  ;;  %v934_v2 = vpop.f32.mrb[58].mxu1  ;;  %v1873_v58 = vsel %vm1852_vm3, %v1487_v53, %v1872_v23  ;;  %v3380_v23 = vld [vmem:[#allocation5 + $0x210] sm:$0xff] }
 0x1f2   :  { %v1496_v63 = vsel %vm1360_vm6, %v1451_v61, -inf  ;;  %v1380_v9 = vrot.slane %v773_v62, 2  ;;  %v1555_v10 = vrot.slane %v934_v2, 1  ;;  %v775_v11 = vpop.f32.mrb[59].mxu0  ;;  %v936_v26 = vpop.f32.mrb[59].mxu1 }
 0x1f3   :  { %v1493_v14 = vmax.f32 %v1491_v50, %v1492_v7  ;;  %v1497_v17 = vmax.f32 %v1450_v59, %v1496_v63  ;;  %v1627_v12 = vrot.slane %v936_v26, 2 }
 0x1f4   :  { %v1381_v24 = vsel %vm1360_vm6, %v1379_v51, %v1380_v9  ;;  %v1414_v25 = vadd.f32 %v1380_v9, %v3273_v21  ;;  %v1556_v28 = vsel %vm1112_vm0, %v1554_v19, %v1555_v10  ;;  %v1589_v45 = vadd.f32 %v1555_v10, %v775_v11 }
 0x1f5   :  { %v1494_v18 = vrot.slane %v1493_v14, 1  ;;  %v1498_v1 = vrot.slane %v1497_v17, 4  ;;  %v1413_v22 = vadd.f32 %v1381_v24, %v3275_v33  ;;  %v1588_v32 = vadd.f32 %v1556_v28, %v769_v54  ;;  %v779_v8 = vpop.f32.mrb[60].mxu0  ;;  %v940_v35 = vpop.f32.mrb[60].mxu1 }
 0x1f6   :  { %v1437_v21 = vadd.f32 %v3293_v52, %v1414_v25  ;;  %v1628_v40 = vsel %vm1360_vm6, %v1626_v16, %v1627_v12  ;;  %v3389_v49 = vadd.f32 %v1627_v12, %v1589_v45  ;;  %v781_v41 = vpop.f32.mrb[61].mxu0  ;;  %v942_v42 = vpop.f32.mrb[61].mxu1  ;;  %v2584_v54 = vpack.c.bf16 %v3380_v23, %v3378_v29 }
 0x1f7   :  { %v1499_v43 = vmax.f32 %v1497_v17, %v1498_v1  ;;  %v1436_v39 = vadd.f32 %v3293_v52, %v1413_v22  ;;  %v3392_v44 = vadd.f32 %v1628_v40, %v1588_v32  ;;  %v1495_v46 = vmax.f32 %v1493_v14, %v1494_v18  ;;  %v3405_v22 = vld [vmem:[#allocation5 + $0x220] sm:$0xff]  ;;  %v3412_v40 = vld [vmem:[#allocation5 + $0x248] sm:$0xff] }
 0x1f8   :  { %v1453_v33 = vmax.f32 %v1437_v21, 0.0  ;;  %v1382_v55 = vrot.slane %v779_v8, 2  ;;  %v1557_v61 = vrot.slane %v940_v35, 1  ;;  %v1629_v26 = vrot.slane %v942_v42, 2  ;;  %v3414_v42 = vld [vmem:[#allocation5 + $0x258] sm:$0xff] }
 0x1f9   :  { %v1500_v53 = vrot.slane %v1499_v43, 2  ;;  %v1452_v50 = vmax.f32 %v1436_v39, 0.0  ;;  %v785_v7 = vpop.f32.mrb[62].mxu0  ;;  %v946_v59 = vpop.f32.mrb[62].mxu1  ;;  %v1874_v9 = vsel %vm1854_vm4, %v1495_v46, %v1873_v58  ;;  %v3407_v58 = vld [vmem:[#allocation5 + $0x230] sm:$0xff] }
 0x1fa   :  { %v1504_v51 = vsel %vm1360_vm6, %v1453_v33, -inf  ;;  %v1383_v62 = vrot.slane %v785_v7, 2  ;;  %v1558_v2 = vrot.slane %v946_v59, 1  ;;  %v787_v63 = vpop.f32.mrb[63].mxu0  ;;  %v948_v19 = vpop.f32.mrb[63].mxu1 }
 0x1fb   :  { %v1501_v10 = vmax.f32 %v1499_v43, %v1500_v53  ;;  %v1505_v11 = vmax.f32 %v1452_v50, %v1504_v51  ;;  %v1630_v14 = vrot.slane %v948_v19, 2  ;;  %v3422_v39 = vld [vmem:[%s3555_s2 + $0x2] ss:$0 sm:$0xff]  ;;  %v2590_v51 = vpack.c.bf16 %v3414_v42, %v3412_v40 }
 0x1fc   :  { %v1384_v17 = vsel %vm1360_vm6, %v1382_v55, %v1383_v62  ;;  %v1416_v16 = vadd.f32 %v1383_v62, %v3283_v6  ;;  %v1559_v12 = vsel %vm1112_vm0, %v1557_v61, %v1558_v2  ;;  %v1591_v24 = vadd.f32 %v1558_v2, %v787_v63  ;;  %v3430_v62 = vld [vmem:[#allocation5 + $0x240] sm:$0xff]  ;;  %v3432_v2 = vld [vmem:[#allocation5 + $0x250] sm:$0xff] }
 0x1fd   :  { %v1506_v25 = vrot.slane %v1505_v11, 4  ;;  %v1415_v28 = vadd.f32 %v1384_v17, %v3285_v15  ;;  %v1590_v45 = vadd.f32 %v1559_v12, %v781_v41  ;;  %v1631_v18 = vsel %vm1360_vm6, %v1629_v26, %v1630_v14  ;;  %v2336_v1 = vpop.f32.mrb[64].mxu0  ;;  %v3437_v26 = vld [vmem:[#allocation5 + $0x268] sm:$0xff] }
 0x1fe   :  { %v1439_v32 = vadd.f32 %v3293_v52, %v1416_v16  ;;  %v3410_v8 = vadd.f32 %v1630_v14, %v1591_v24  ;;  %v1682_v35 = vrot.slane %v2336_v1, 3  ;;  %v1017_v6 = vpop.f32.mrb[65].mxu0  ;;  %v1502_v21 = vrot.slane %v1501_v10, 1  ;;  %v3439_v14 = vld [vmem:[#allocation5 + $0x278] sm:$0xff] }
 0x1ff   :  { %v1507_v15 = vmax.f32 %v1505_v11, %v1506_v25  ;;  %v1438_v41 = vadd.f32 %v3293_v52, %v1415_v28  ;;  %v3417_v43 = vadd.f32 %v1631_v18, %v1590_v45  ;;  %v1681_v33 = vrot.slane %v1017_v6, 3 }
 0x200   :  { %v1455_v46 = vmax.f32 %v1439_v32, 0.0  ;;  %v1722_v53 = vadd.f32 %v1682_v35, %v3303_v3  ;;  %v1503_v50 = vmax.f32 %v1501_v10, %v1502_v21  ;;  %v2588_v55 = vpack.c.bf16 %v3407_v58, %v3405_v22  ;;  %v3449_v21 = vld [vmem:[#allocation5 + $0x260] sm:$0xff] }
 0x201   :  { %v1508_v61 = vrot.slane %v1507_v15, 2  ;;  %v1454_v7 = vmax.f32 %v1438_v41, 0.0  ;;  %v1683_v59 = vsel %vm1680_vm9, %v1681_v33, %v1682_v35  ;;  %v2339_v52 = vpop.f32.mrb[66].mxu0  ;;  %v2592_v18 = vpack.c.bf16 %v3432_v2, %v3430_v62  ;;  %v1982_v62 = vld [vmem:[#allocation5 + $0x2b8] sm:$0xff] }
 0x202   :  { %v1512_v63 = vsel %vm1360_vm6, %v1455_v46, -inf  ;;  %v1745_v3 = vadd.f32 %v3422_v39, %v1722_v53  ;;  %v1721_v19 = vadd.f32 %v1683_v59, %v3305_v4  ;;  %v1685_v10 = vrot.slane %v2339_v52, 3  ;;  %v1027_v11 = vpop.f32.mrb[67].mxu0 }
 0x203   :  { %v1513_v17 = vmax.f32 %v1454_v7, %v1512_v63  ;;  %v1684_v16 = vrot.slane %v1027_v11, 3  ;;  %v1509_v12 = vmax.f32 %v1507_v15, %v1508_v61  ;;  %v1875_v24 = vsel %vm1856_vm5, %v1503_v50, %v1874_v9  ;;  %v3451_v15 = vld [vmem:[#allocation5 + $0x270] sm:$0xff] }
 0x204   :  { %v1761_v25 = vmax.f32 %v1745_v3, 0.0  ;;  %v1744_v28 = vadd.f32 %v3422_v39, %v1721_v19  ;;  %v1724_v45 = vadd.f32 %v1685_v10, %v3318_v30  ;;  %v2594_v6 = vpack.c.bf16 %v3439_v14, %v3437_v26 }
 0x205   :  { %v1514_v4 = vrot.slane %v1513_v17, 4  ;;  %v1686_v1 = vsel %vm1680_vm9, %v1684_v16, %v1685_v10  ;;  %v2342_v32 = vpop.f32.mrb[68].mxu0  ;;  %v1510_v35 = vrot.slane %v1509_v12, 1  ;;  %v2596_v3 = vpack.c.bf16 %v3451_v15, %v3449_v21 }
 0x206   :  { %v1776_v9 = vsel %vm1680_vm9, %v1761_v25, -inf  ;;  %v1760_v41 = vmax.f32 %v1744_v28, 0.0  ;;  %v1747_v30 = vadd.f32 %v3422_v39, %v1724_v45  ;;  %v1723_v33 = vadd.f32 %v1686_v1, %v3316_v47  ;;  %v1037_v46 = vpop.f32.mrb[69].mxu0  ;;  %v3462_v25 = vld [vmem:[#allocation5 + $0x288] sm:$0xff] }
 0x207   :  { %v1515_v53 = vmax.f32 %v1513_v17, %v1514_v4  ;;  %v1688_v50 = vrot.slane %v2342_v32, 3  ;;  %v1687_v61 = vrot.slane %v1037_v46, 3  ;;  %v1511_v7 = vmax.f32 %v1509_v12, %v1510_v35  ;;  %v3464_v17 = vld [vmem:[#allocation5 + $0x298] sm:$0xff] }
 0x208   :  { %v1777_v59 = vmax.f32 %v1760_v41, %v1776_v9  ;;  %v1763_v52 = vmax.f32 %v1747_v30, 0.0  ;;  %v1746_v63 = vadd.f32 %v3422_v39, %v1723_v33 }
 0x209   :  { %v1726_v19 = vadd.f32 %v1688_v50, %v3327_v31  ;;  %v1689_v10 = vsel %vm1680_vm9, %v1687_v61, %v1688_v50  ;;  %v2345_v11 = vpop.f32.mrb[70].mxu0  ;;  %v1516_v16 = vrot.slane %v1515_v53, 2  ;;  %v1876_v47 = vsel %vm1858_vm7, %v1511_v7, %v1875_v24 }
 0x20a   :  { %v1778_v12 = vrot.slane %v1777_v59, 4  ;;  %v1784_v28 = vsel %vm1680_vm9, %v1763_v52, -inf  ;;  %v1762_v45 = vmax.f32 %v1746_v63, 0.0  ;;  %v1725_v4 = vadd.f32 %v1689_v10, %v3330_v34  ;;  %v1047_v1 = vpop.f32.mrb[71].mxu0 }
 0x20b   :  { %v1749_v32 = vadd.f32 %v3422_v39, %v1726_v19  ;;  %v1691_v31 = vrot.slane %v2345_v11, 3  ;;  %v1690_v35 = vrot.slane %v1047_v1, 3  ;;  %v1517_v9 = vmax.f32 %v1515_v53, %v1516_v16 }
 0x20c   :  { %v1779_v41 = vmax.f32 %v1777_v59, %v1778_v12  ;;  %v1785_v30 = vmax.f32 %v1762_v45, %v1784_v28  ;;  %v1748_v24 = vadd.f32 %v3422_v39, %v1725_v4 }
 0x20d   :  { %v1765_v46 = vmax.f32 %v1749_v32, 0.0  ;;  %v1728_v50 = vadd.f32 %v1691_v31, %v3342_v20  ;;  %v1692_v61 = vsel %vm1680_vm9, %v1690_v35, %v1691_v31  ;;  %v2348_v7 = vpop.f32.mrb[72].mxu0  ;;  %v1518_v34 = vrot.slane %v1517_v9, 1 }
 0x20e   :  { %v1780_v52 = vrot.slane %v1779_v41, 2  ;;  %v1786_v63 = vrot.slane %v1785_v30, 4  ;;  %v1764_v19 = vmax.f32 %v1748_v24, 0.0  ;;  %v1727_v10 = vadd.f32 %v1692_v61, %v3345_v27  ;;  %v1057_v53 = vpop.f32.mrb[73].mxu0 }
 0x20f   :  { %v1792_v59 = vsel %vm1680_vm9, %v1765_v46, -inf  ;;  %v1751_v11 = vadd.f32 %v3422_v39, %v1728_v50  ;;  %v1694_v16 = vrot.slane %v2348_v7, 3  ;;  %v1693_v12 = vrot.slane %v1057_v53, 3 }
 0x210   :  { %v1781_v28 = vmax.f32 %v1779_v41, %v1780_v52  ;;  %v1787_v45 = vmax.f32 %v1785_v30, %v1786_v63  ;;  %v1793_v4 = vmax.f32 %v1764_v19, %v1792_v59  ;;  %v1750_v20 = vadd.f32 %v3422_v39, %v1727_v10 }
 0x211   :  { %v1767_v1 = vmax.f32 %v1751_v11, 0.0  ;;  %v1730_v32 = vadd.f32 %v1694_v16, %v3355_v0  ;;  %v1695_v31 = vsel %vm1680_vm9, %v1693_v12, %v1694_v16  ;;  %v2351_v35 = vpop.f32.mrb[74].mxu0  ;;  %v1519_v24 = vmax.f32 %v1517_v9, %v1518_v34 }
 0x212   :  { %v1782_v27 = vrot.slane %v1781_v28, 1  ;;  %v1788_v61 = vrot.slane %v1787_v45, 2  ;;  %v1794_v57 = vrot.slane %v1793_v4, 4  ;;  %v1766_v46 = vmax.f32 %v1750_v20, 0.0  ;;  %v1067_v33 = vpop.f32.mrb[75].mxu0 }
 0x213   :  { %v1800_v50 = vsel %vm1680_vm9, %v1767_v1, -inf  ;;  %v1753_v41 = vadd.f32 %v3422_v39, %v1730_v32  ;;  %v1729_v30 = vadd.f32 %v1695_v31, %v3358_v60  ;;  %v1697_v7 = vrot.slane %v2351_v35, 3 }
 0x214   :  { %v1783_v52 = vmax.f32 %v1781_v28, %v1782_v27  ;;  %v1789_v63 = vmax.f32 %v1787_v45, %v1788_v61  ;;  %v1795_v19 = vmax.f32 %v1793_v4, %v1794_v57  ;;  %v1801_v0 = vmax.f32 %v1766_v46, %v1800_v50 }
 0x215   :  { %v1769_v10 = vmax.f32 %v1753_v41, 0.0  ;;  %v1752_v53 = vadd.f32 %v3422_v39, %v1729_v30  ;;  %v1732_v9 = vadd.f32 %v1697_v7, %v3368_v48  ;;  %v1696_v34 = vrot.slane %v1067_v33, 3  ;;  %v2354_v59 = vpop.f32.mrb[76].mxu0 }
 0x216   :  { %v1790_v11 = vrot.slane %v1789_v63, 1  ;;  %v1796_v16 = vrot.slane %v1795_v19, 2  ;;  %v1802_v12 = vrot.slane %v1801_v0, 4  ;;  %v1877_v20 = vsel %vm1860_vm8, %v1519_v24, %v1876_v47  ;;  %v1077_v1 = vpop.f32.mrb[77].mxu0 }
 0x217   :  { %v1808_v60 = vsel %vm1680_vm9, %v1769_v10, -inf  ;;  %v1768_v32 = vmax.f32 %v1752_v53, 0.0  ;;  %v1755_v28 = vadd.f32 %v3422_v39, %v1732_v9  ;;  %v1698_v57 = vsel %vm1680_vm9, %v1696_v34, %v1697_v7  ;;  %2067 = vmatprep.mubr.f32.mxu1 %v1877_v20  ;;  %v1975_v20 = vld [vmem:[#allocation5 + $0x280] sm:$0xff] }
 0x218   :  { %v1791_v45 = vmax.f32 %v1789_v63, %v1790_v11  ;;  %v1797_v4 = vmax.f32 %v1795_v19, %v1796_v16  ;;  %v1803_v31 = vmax.f32 %v1801_v0, %v1802_v12  ;;  %v1731_v48 = vadd.f32 %v1698_v57, %v3371_v56  ;;  %2068 = vmatmul.mubr.f32.vlgmr.msra.gmra.mrb[64].mxu1 %v3333_v37 }
 0x219   :  { %v1809_v33 = vmax.f32 %v1768_v32, %v1808_v60  ;;  %v1771_v35 = vmax.f32 %v1755_v28, 0.0  ;;  %2585 = vmatpush1.bf16.msra.mxu1 %v2584_v54  ;;  %v1700_v47 = vrot.slane %v2354_v59, 3  ;;  %v1699_v24 = vrot.slane %v1077_v1, 3  ;;  %v2357_v27 = vpop.f32.mrb[78].mxu0  ;;  %2138 = vmatprep.mubr.f32.mxu1 %v2713_v5  ;;  %v1980_v28 = vld [vmem:[#allocation5 + $0x2a8] sm:$0xff] }
 0x21a   :  { %v1798_v61 = vrot.slane %v1797_v4, 1  ;;  %v1804_v46 = vrot.slane %v1803_v31, 2  ;;  %v1754_v50 = vadd.f32 %v3422_v39, %v1731_v48  ;;  %2587 = vmatprep.subr.bf16.mxu1 %v2586_v36  ;;  %v1703_v37 = vrot.slane %v2357_v27, 3  ;;  %v1087_v56 = vpop.f32.mrb[79].mxu0  ;;  %v1981_v48 = vld [vmem:[#allocation5 + $0x2b0] sm:$0xff] }
 0x21b   :  { %v1810_v41 = vrot.slane %v1809_v33, 4  ;;  %v1816_v30 = vsel %vm1680_vm9, %v1771_v35, -inf  ;;  %v1734_v29 = vadd.f32 %v1700_v47, %v3389_v49  ;;  %v1701_v23 = vsel %vm1680_vm9, %v1699_v24, %v1700_v47  ;;  %v1984_v35 = vld [vmem:[#allocation5 + $0x2c8] sm:$0xff]  ;;  %v1986_v47 = vld [vmem:[#allocation5 + $0x2d8] sm:$0xff] }
 0x21c   :  { %v1799_v54 = vmax.f32 %v1797_v4, %v1798_v61  ;;  %v1805_v7 = vmax.f32 %v1803_v31, %v1804_v46  ;;  %v1770_v5 = vmax.f32 %v1754_v50, 0.0  ;;  %v1733_v63 = vadd.f32 %v1701_v23, %v3392_v44  ;;  %v1979_v31 = vld [vmem:[#allocation5 + $0x2a0] sm:$0xff] }
 0x21d   :  { %v1811_v19 = vmax.f32 %v1809_v33, %v1810_v41  ;;  %v1757_v0 = vadd.f32 %v3422_v39, %v1734_v29  ;;  %2589 = vmatpush1.bf16.msra.mxu1 %v2588_v55  ;;  %v1736_v13 = vadd.f32 %v1703_v37, %v3410_v8  ;;  %v1702_v38 = vrot.slane %v1087_v56, 3  ;;  %v1983_v50 = vld [vmem:[#allocation5 + $0x2c0] sm:$0xff]  ;;  %v1988_v56 = vld [vmem:[#allocation5 + $0x2e8] sm:$0xff]  ;;  %v1990_v41 = vld [vmem:[#allocation5 + $0x2f8] sm:$0xff] }
 0x21e   :  { %v1806_v36 = vrot.slane %v1805_v7, 1  ;;  %v1817_v10 = vmax.f32 %v1770_v5, %v1816_v30  ;;  %v1756_v49 = vadd.f32 %v3422_v39, %v1733_v63  ;;  %2591 = vmatprep.subr.bf16.mxu1 %v2590_v51  ;;  %v1887_v44 = vsel %vm1848_vm1, %v1791_v45, %v1783_v52  ;;  %v1987_v5 = vld [vmem:[#allocation5 + $0x2e0] sm:$0xff]  ;;  %v1989_v63 = vld [vmem:[#allocation5 + $0x2f0] sm:$0xff] }
 0x21f   :  { %v1812_v53 = vrot.slane %v1811_v19, 2  ;;  %v1773_v9 = vmax.f32 %v1757_v0, 0.0  ;;  %v1759_v34 = vadd.f32 %v3422_v39, %v1736_v13  ;;  %v1704_v22 = vsel %vm1680_vm9, %v1702_v38, %v1703_v37  ;;  %v1985_v37 = vld [vmem:[#allocation5 + $0x2d0] sm:$0xff] }
 0x220   :  { %v1807_v58 = vmax.f32 %v1805_v7, %v1806_v36  ;;  %v1818_v55 = vrot.slane %v1817_v10, 4  ;;  %v1772_v8 = vmax.f32 %v1756_v49, 0.0  ;;  %v1735_v59 = vadd.f32 %v1704_v22, %v3417_v43  ;;  %v1977_v43 = vld [vmem:[#allocation5 + $0x290] sm:$0xff] }
 0x221   :  { %v1813_v11 = vmax.f32 %v1811_v19, %v1812_v53  ;;  %v1824_v16 = vsel %vm1680_vm9, %v1773_v9, -inf  ;;  %v1775_v12 = vmax.f32 %v1759_v34, 0.0  ;;  %2593 = vmatpush1.bf16.msra.mxu1 %v2592_v18  ;;  %v1888_v40 = vsel %vm1850_vm2, %v1799_v54, %v1887_v44  ;;  %v1991_v34 = vld [vmem:[%s3557_s4] sm:$0x3]  ;;  %s2678_s4 = scalar_lea.vmem %s2161_s6, 128 }
 0x222   :  { %v1819_v42 = vmax.f32 %v1817_v10, %v1818_v55  ;;  %v1825_v51 = vmax.f32 %v1772_v8, %v1824_v16  ;;  %v1758_v52 = vadd.f32 %v3422_v39, %v1735_v59  ;;  %2595 = vmatprep.subr.bf16.mxu1 %v2594_v6  ;;  %v1889_v1 = vsel %vm1852_vm3, %v1807_v58, %v1888_v40  ;;  %p2679_p2 = scmp.ne.s32.totalorder %s2161_s6, %s2678_s4  ;;  %p2684_p4 = scmp.lt.s32.totalorder %s2678_s4, %s2678_s4 }
 0x223   :  { %v1814_v60 = vrot.slane %v1813_v11, 1  ;;  %v1832_v32 = vsel %vm1680_vm9, %v1775_v12, -inf  ;;  %v2600_v39 = vpack.c.bf16 %v1977_v43, %v1975_v20  ;;  %v3592_v6 = vpack.c.bf16 %v3464_v17, %v3462_v25 }
 0x224   :  { %v1820_v2 = vrot.slane %v1819_v42, 2  ;;  %v1826_v18 = vrot.slane %v1825_v51, 4  ;;  %v1774_v57 = vmax.f32 %v1758_v52, 0.0  ;;  %v2602_v4 = vpack.c.bf16 %v1982_v62, %v1980_v28  ;;  %p2685_p5 = por %p2684_p4, %p2683_p3 }
 0x225   :  { %2597 = vmatpush1.bf16.msra.mxu1 %v2596_v3  ;;  %v1815_v45 = vmax.f32 %v1813_v11, %v1814_v60  ;;  %v2604_v15 = vpack.c.bf16 %v1981_v48, %v1979_v31  ;;  %v2606_v46 = vpack.c.bf16 %v1986_v47, %v1984_v35  ;;  %v2608_v54 = vpack.c.bf16 %v1985_v37, %v1983_v50 }
 0x226   :  { %v1827_v26 = vmax.f32 %v1825_v51, %v1826_v18  ;;  %v1833_v14 = vmax.f32 %v1774_v57, %v1832_v32  ;;  %2599 = vmatprep.subr.bf16.mxu1 %v3592_v6  ;;  %v1821_v33 = vmax.f32 %v1819_v42, %v1820_v2  ;;  %v2610_v7 = vpack.c.bf16 %v1990_v41, %v1988_v56  ;;  %p2686_p6 = pnand %p2685_p5, %p2679_p2 }
 0x227   :  { %v1890_v24 = vsel %vm1854_vm4, %v1815_v45, %v1889_v1  ;;  %v2612_v36 = vpack.c.bf16 %v1989_v63, %v1987_v5  ;;  %v3593_v44 = vlaneseq }
 0x228   :  { %v1834_v27 = vrot.slane %v1833_v14, 4  ;;  %v1822_v61 = vrot.slane %v1821_v33, 1  ;;  %v1828_v21 = vrot.slane %v1827_v26, 2 }
 0x229   :  { %2601 = vmatpush1.bf16.msra.mxu1 %v2600_v39  ;;  %v1994_v53 = vshrl.u32 %v3593_v44, 7 }
 0x22a   :  { %v1835_v3 = vmax.f32 %v1833_v14, %v1834_v27  ;;  %2603 = vmatprep.subr.bf16.mxu1 %v2602_v4  ;;  %v1823_v25 = vmax.f32 %v1821_v33, %v1822_v61  ;;  %v1829_v17 = vmax.f32 %v1827_v26, %v1828_v21 }
 0x22b   :  { %v1995_v9 = vsub.s32 0, %v1994_v53  ;;  %v1999_v16 = vsub.s32 1, %v1994_v53 }
 0x22c   :  { %v1830_v30 = vrot.slane %v1829_v17, 1  ;;  %v1836_v29 = vrot.slane %v1835_v3, 2  ;;  %v1891_v23 = vsel %vm1856_vm5, %v1823_v25, %v1890_v24 }
 0x22d   :  { %2605 = vmatpush1.bf16.msra.mxu1 %v2604_v15  ;;  %v1996_v22 = vrot.slane %v1991_v34, %v1995_v9  ;;  %v2000_v40 = vrot.slane %v1991_v34, %v1999_v16 }
 0x22e   :  { %2607 = vmatprep.subr.bf16.mxu1 %v2606_v46  ;;  %v1831_v19 = vmax.f32 %v1829_v17, %v1830_v30  ;;  %v1837_v0 = vmax.f32 %v1835_v3, %v1836_v29 }
 0x230   :  { %v1838_v13 = vrot.slane %v1837_v0, 1  ;;  %v1892_v38 = vsel %vm1858_vm7, %v1831_v19, %v1891_v23 }
 0x231   :  { %2609 = vmatpush1.bf16.msra.mxu1 %v2608_v54 }
 0x232   :  { %2611 = vmatprep.subr.bf16.mxu1 %v2610_v7  ;;  %v1839_v10 = vmax.f32 %v1837_v0, %v1838_v13 }
 0x234   :  { %v1893_v49 = vsel %vm1860_vm8, %v1839_v10, %v1892_v38 }
 0x235   :  { %2613 = vmatpush1.bf16.msra.mxu1 %v2612_v36 }
 0x238   :  { %2139 = vmatmul.mubr.f32.vlgmr.msra.gmra.mrb[64].mxu1 %v1893_v49 }
 0x30b   :  { %v2140_v58 = vpop.f32.mrb[64].mxu1 }
 0x30c   :  { %v2614_v55 = vadd.f32 %v2140_v58, %v1996_v22  ;;  %v2142_v8 = vpop.f32.mrb[65].mxu1 }
 0x30d   :  { %v2615_v42 = vadd.f32 %v2142_v8, %v2000_v40 }
 0x30e   :  { %v2269_v59 = vmul.f32 -1.442695, %v2614_v55 }
 0x30f   :  { %v2151_v51 = vmax.f32 %v2615_v42, 0.0 }
 0x310   :  { %2630 = vpow2.f32 %v2269_v59 }
 0x31a   :  { %v2631_v11 = vpop.eup %2630 }
 0x31b   :  { %v2148_v12 = vadd.f32 1.0, %v2631_v11 }
 0x31d   :  { %2632 = vrcp.f32 %v2148_v12 }
 0x327   :  { %v2633_v52 = vpop.eup %2632 }
 0x328   :  { %v2152_v20 = vmul.f32 %v2633_v52, %v2151_v51 }
 0x32a   :  { %2153 = vst [vmem:[#allocation7] sm:$0xff] %v2152_v20 }
 0x32b   :  { %2689 = shalt.err (!%p2686_p6)
}
 0x32c   :  { %s2690_s9 = scalar_lea.hbm %s3558_s5, 128 }
 0x32d   :  { %p2691_p7 = scmp.ne.s32.totalorder %s3558_s5, %s2690_s9  ;;  %p2694_p8 = scmp.lt.u32.totalorder %s2690_s9, %s3558_s5 }
 0x32f   :  { %p2696_p9 = pnand %p2694_p8, %p2691_p7 }
 0x331   :  { %2699 = shalt.err (!%p2696_p9)
}
 0x332   :  { %2163 = dma.vmem_to_hbm [thread:$0]  %s2161_s6, 128, %s3558_s5, [#allocation4]  }
 0x333   :  { %2704 = dma.done.wait [#allocation4], 128  }
 0x334   :  { %2705 = vsyncadd [#allocation4], 4294967168 }
 0x335   :  { %2167 = vsyncpa [#allocation3], 1 }
 0x336   :  { %2168 = vsyncpa [#allocation6], 1 }
 0x337   :  { %2169 = vsyncpa [#allocation4], 1 }

</bundles_post_ra>
